<compile_context>
chip_gen: v7x
topology: tpu7x:2x2x1
jax: 0.10.0
libtpu: 0.0.40
codegen_flags: <defaults>
</compile_context>

<pallas_src>
import jax
import jax.numpy as jnp
from jax import lax
from jax.experimental import pallas as pl
from jax.experimental.pallas import tpu as pltpu


def self_attention_kernel(x_q_ref, x_kv_ref, wq_ref, bq_ref, wkv_ref, bkv_ref,
                          gamma_ref, o_ref, k_sc, v_sc):
    # Shapes:
    #   x_q_ref  : (1, TQ, Cp) f32   -- query rows for this tile
    #   x_kv_ref : (1, N,  Cp) f32   -- full sequence (for K/V projection)
    #   wq_ref   : (Cp, C8)   bf16
    #   wkv_ref  : (Cp, Cp+C8) bf16  -- fused [Wv | Wk]
    #   k_sc     : (N, C8)  bf16 scratch, v_sc : (N, Cp) bf16 scratch
    Cp = v_sc.shape[-1]

    # Project K and V once per batch element (first query tile) into scratch.
    @pl.when(pl.program_id(1) == 0)
    def _():
        x_full = x_kv_ref[0].astype(jnp.bfloat16)                       # (N, Cp)
        kv = jnp.dot(x_full, wkv_ref[...],
                     preferred_element_type=jnp.float32) + bkv_ref[...]  # (N, Cp+C8) f32
        v_sc[...] = kv[:, :Cp].astype(jnp.bfloat16)                     # (N, Cp)
        k_sc[...] = kv[:, Cp:].astype(jnp.bfloat16)                     # (N, C8)

    x_tile = x_q_ref[0]                                                 # (TQ, Cp) f32

    # Query projection for this tile: bf16 MXU inputs, f32 accumulation + bias.
    q = jnp.dot(x_tile.astype(jnp.bfloat16), wq_ref[...],
                preferred_element_type=jnp.float32) + bq_ref[...]       # (TQ, C8) f32
    q = q.astype(jnp.bfloat16)

    # scores = q @ k^T, contracting on the shared C8 dim (k in natural layout).
    scores = lax.dot_general(
        q, k_sc[...],
        dimension_numbers=(((1,), (1,)), ((), ())),
        preferred_element_type=jnp.float32)                             # (TQ, N) f32

    # Numerically-stable softmax in f32 (no 1/sqrt(d) scale, matching SAGAN).
    scores = scores - jnp.max(scores, axis=-1, keepdims=True)
    e = jnp.exp(scores)
    attn = e * pl.reciprocal(jnp.sum(e, axis=-1, keepdims=True), approx=True)

    # out = attn @ v, bf16 MXU inputs with f32 accumulation.
    out = jnp.dot(attn.astype(jnp.bfloat16), v_sc[...],
                  preferred_element_type=jnp.float32)                   # (TQ, Cp) f32

    gamma = gamma_ref[0, 0]                                             # SMEM scalar
    o_ref[0] = (gamma * out + x_tile).astype(o_ref.dtype)


def self_attention_pallas(x_nchw, wq, bq, wk, bk, wv, bv, gamma):
    """x_nchw: (B, C, H, W) float32 -> (B, C, H, W) float32."""
    B, C, H, W = x_nchw.shape
    N = H * W
    C8 = wq.shape[1]

    # Pad channels to a lane-dense multiple of 128 (padding is zero-transparent).
    Cp = max(128, ((C + 127) // 128) * 128)

    # NCHW -> (B, N, C) -> channel-padded (B, N, Cp).
    # TODO(synk): keep activations channels-last upstream to avoid this extra HBM pass.
    x_bnc = jnp.transpose(x_nchw.reshape(B, C, N), (0, 2, 1))
    x_pad = jnp.pad(x_bnc, ((0, 0), (0, 0), (0, Cp - C)))

    # Pad projection weights; fuse K and V into one (Cp, Cp + C8) matmul.
    # V comes first so both kernel-side slices start on 128-lane boundaries.
    wq_p = jnp.pad(wq, ((0, Cp - C), (0, 0))).astype(jnp.bfloat16)        # (Cp, C8)
    wv_p = jnp.pad(wv, ((0, Cp - C), (0, Cp - C)))                        # (Cp, Cp)
    wk_p = jnp.pad(wk, ((0, Cp - C), (0, 0)))                             # (Cp, C8)
    wkv = jnp.concatenate([wv_p, wk_p], axis=1).astype(jnp.bfloat16)      # (Cp, Cp+C8)
    bkv = jnp.concatenate([jnp.pad(bv, ((0, 0), (0, Cp - C))), bk],
                          axis=1).astype(jnp.float32)                     # (1, Cp+C8)

    # Query-tile size: multiple of the 8-sublane granule; small enough for v7x's
    # 64 MiB VMEM at real SAGAN sizes (use 256 on v6e/v5e if VMEM allows).
    TQ = 128 if N % 128 == 0 else N
    NQ = N // TQ

    out_pad = pl.pallas_call(
        self_attention_kernel,
        out_shape=jax.ShapeDtypeStruct((B, N, Cp), jnp.float32),
        grid_spec=pltpu.PrefetchScalarGridSpec(
            num_scalar_prefetch=0,
            grid=(B, NQ),
            in_specs=[
                pl.BlockSpec((1, TQ, Cp), lambda b, q: (b, q, 0)),      # x (query tile)
                pl.BlockSpec((1, N, Cp), lambda b, q: (b, 0, 0)),       # x (full, K/V)
                pl.BlockSpec((Cp, C8), lambda b, q: (0, 0)),            # Wq (bf16)
                pl.BlockSpec((1, C8), lambda b, q: (0, 0)),             # bq
                pl.BlockSpec((Cp, Cp + C8), lambda b, q: (0, 0)),       # [Wv|Wk] (bf16)
                pl.BlockSpec((1, Cp + C8), lambda b, q: (0, 0)),        # [bv|bk]
                pl.BlockSpec(memory_space=pltpu.MemorySpace.SMEM),      # gamma scalar
            ],
            out_specs=pl.BlockSpec((1, TQ, Cp), lambda b, q: (b, q, 0)),
            scratch_shapes=[
                pltpu.VMEM((N, C8), jnp.bfloat16),   # K, resident across query tiles
                pltpu.VMEM((N, Cp), jnp.bfloat16),   # V, resident across query tiles
            ],
        ),
        compiler_params=pltpu.CompilerParams(
            # query-tile axis must be "arbitrary": K/V scratch is filled at q==0
            # and reused across the tile sweep; batch axis shards across cores.
            dimension_semantics=("parallel", "arbitrary"),
            vmem_limit_bytes=64 * 1024 * 1024,
        ),
    )(x_pad, x_pad, wq_p, bq, wkv, bkv, gamma)

    # Drop channel padding, (B, N, C) -> NCHW.
    out_bnc = out_pad[:, :, :C]
    return jnp.transpose(out_bnc, (0, 2, 1)).reshape(B, C, H, W)


def reference_jax(x_nchw, wq, bq, wk, bk, wv, bv, gamma):
    """Pure-JAX f32 reference mirroring the PyTorch forward exactly."""
    B, C, H, W = x_nchw.shape
    N = H * W
    x_bnc = jnp.transpose(x_nchw.reshape(B, C, N), (0, 2, 1))       # (B, N, C)
    q = x_bnc @ wq + bq                                             # (B, N, C8)
    k = x_bnc @ wk + bk                                             # (B, N, C8)
    v = x_bnc @ wv + bv                                             # (B, N, C)
    attn = jax.nn.softmax(jnp.einsum("bnc,bmc->bnm", q, k), axis=-1)
    out = jnp.einsum("bnm,bmc->bnc", attn, v)
    res = gamma[0, 0] * out + x_bnc
    return jnp.transpose(res, (0, 2, 1)).reshape(B, C, H, W)


if __name__ == "__main__":
    # Small shapes consistent with the module (in_dim >= 8 so C//8 >= 1).
    B, C, H, W = 2, 32, 16, 16
    C8 = C // 8

    key = jax.random.PRNGKey(0)
    k_x, k_wq, k_bq, k_wk, k_bk, k_wv, k_bv = jax.random.split(key, 7)

    x = jax.random.normal(k_x, (B, C, H, W), dtype=jnp.float32)

    # Parameters (nn.Conv2d(in, out, 1) -> weight (out, in, 1, 1); stored as (in, out)).
    wq = jax.random.normal(k_wq, (C, C8), dtype=jnp.float32) * 0.1
    bq = jax.random.normal(k_bq, (1, C8), dtype=jnp.float32) * 0.1
    wk = jax.random.normal(k_wk, (C, C8), dtype=jnp.float32) * 0.1
    bk = jax.random.normal(k_bk, (1, C8), dtype=jnp.float32) * 0.1
    wv = jax.random.normal(k_wv, (C, C), dtype=jnp.float32) * 0.1
    bv = jax.random.normal(k_bv, (1, C), dtype=jnp.float32) * 0.1
    # Module inits gamma to zero; nonzero here so the attention path is verified
    # (set to 0.0 to match nn.Parameter(torch.zeros(1)) init exactly).
    gamma = jnp.full((1, 1), 0.5, dtype=jnp.float32)

    out = self_attention_pallas(x, wq, bq, wk, bk, wv, bv, gamma)
    out = jax.block_until_ready(out)

    ref = reference_jax(x, wq, bq, wk, bk, wv, bv, gamma)
    assert out.shape == (B, C, H, W)
    # bf16 MXU inputs + approx reciprocal -> loosen tolerance vs f32 reference.
    assert jnp.allclose(out, ref, atol=2e-2, rtol=2e-2), "mismatch vs reference"

    print("KERNEL_OK")
</pallas_src>

<mosaic_0001>
module attributes {stable_mosaic.version = 11 : i64} {
  func.func @self_attention_kernel(%arg0: i32, %arg1: i32, %arg2: memref<1x128x128xf32, #tpu.memory_space<vmem>>, %arg3: memref<1x256x128xf32, #tpu.memory_space<vmem>>, %arg4: memref<128x4xbf16, #tpu.memory_space<vmem>>, %arg5: memref<1x4xf32, #tpu.memory_space<vmem>>, %arg6: memref<128x132xbf16, #tpu.memory_space<vmem>>, %arg7: memref<1x132xf32, #tpu.memory_space<vmem>>, %arg8: memref<1x1xf32, #tpu.memory_space<smem>>, %arg9: memref<1x128x128xf32, #tpu.memory_space<vmem>>, %arg10: memref<256x4xbf16, #tpu.memory_space<vmem>>, %arg11: memref<256x128xbf16, #tpu.memory_space<vmem>>) attributes {dimension_semantics = [#tpu.dimension_semantics<parallel>, #tpu.dimension_semantics<arbitrary>], iteration_bounds = array<i64: 2, 2>, scalar_prefetch = 0 : i64, scratch_operands = 2 : i64, tpu.core_type = #tpu.core_type<tc>, window_params = [{transform_indices = @transform_0, window_bounds = array<i64: 1, 128, 128>}, {transform_indices = @transform_1, window_bounds = array<i64: 1, 256, 128>}, {pipeline_mode = #tpu.pipeline_mode<synchronous>, transform_indices = @transform_2, window_bounds = array<i64: 128, 4>}, {pipeline_mode = #tpu.pipeline_mode<synchronous>, transform_indices = @transform_3, window_bounds = array<i64: 1, 4>}, {pipeline_mode = #tpu.pipeline_mode<synchronous>, transform_indices = @transform_4, window_bounds = array<i64: 128, 132>}, {pipeline_mode = #tpu.pipeline_mode<synchronous>, transform_indices = @transform_5, window_bounds = array<i64: 1, 132>}, {transform_indices = @transform_6, window_bounds = array<i64: 1, 1>}, {transform_indices = @transform_7, window_bounds = array<i64: 1, 128, 128>}]} {
    %c0_i32 = arith.constant 0 : i32
    %0 = arith.cmpi eq, %arg1, %c0_i32 : i32
    %1 = arith.extui %0 : i1 to i32
    %c0_i32_0 = arith.constant 0 : i32
    %2 = arith.cmpi ne, %1, %c0_i32_0 : i32
    scf.if %2 {
      %c0_20 = arith.constant 0 : index
      %c0_21 = arith.constant 0 : index
      %c0_22 = arith.constant 0 : index
      %34 = vector.load %arg3[%c0_20, %c0_21, %c0_22] : memref<1x256x128xf32, #tpu.memory_space<vmem>>, vector<1x256x128xf32>
      %35 = vector.shape_cast %34 : vector<1x256x128xf32> to vector<256x128xf32>
      %36 = arith.truncf %35 : vector<256x128xf32> to vector<256x128xbf16>
      %c0_23 = arith.constant 0 : index
      %c0_24 = arith.constant 0 : index
      %37 = vector.load %arg6[%c0_23, %c0_24] : memref<128x132xbf16, #tpu.memory_space<vmem>>, vector<128x132xbf16>
      %cst_25 = arith.constant dense<0.000000e+00> : vector<256x132xf32>
      %38 = tpu.matmul %36, %37, %cst_25 {dimension_numbers = #tpu.dot_dimension_numbers<[1], [0], [0], [1], [0, 0, 1, 1], [], []>} : vector<256x128xbf16>, vector<128x132xbf16>, vector<256x132xf32> -> vector<256x132xf32>
      %c0_26 = arith.constant 0 : index
      %c0_27 = arith.constant 0 : index
      %39 = vector.load %arg7[%c0_26, %c0_27] : memref<1x132xf32, #tpu.memory_space<vmem>>, vector<1x132xf32>
      %40 = vector.broadcast %39 : vector<1x132xf32> to vector<256x132xf32>
      %41 = arith.addf %38, %40 : vector<256x132xf32>
      %42 = vector.extract_strided_slice %41 {offsets = [0, 0], sizes = [256, 128], strides = [1, 1]} : vector<256x132xf32> to vector<256x128xf32>
      %43 = arith.truncf %42 : vector<256x128xf32> to vector<256x128xbf16>
      %c0_28 = arith.constant 0 : index
      %c0_29 = arith.constant 0 : index
      %44 = vector.load %arg11[%c0_28, %c0_29] : memref<256x128xbf16, #tpu.memory_space<vmem>>, vector<256x128xbf16>
      tpu.vector_store %arg11[%c0_28, %c0_29], %43 {strides = array<i32>} : memref<256x128xbf16, #tpu.memory_space<vmem>>, vector<256x128xbf16>,
      %45 = vector.extract_strided_slice %41 {offsets = [0, 128], sizes = [256, 4], strides = [1, 1]} : vector<256x132xf32> to vector<256x4xf32>
      %46 = arith.truncf %45 : vector<256x4xf32> to vector<256x4xbf16>
      %c0_30 = arith.constant 0 : index
      %c0_31 = arith.constant 0 : index
      %47 = vector.load %arg10[%c0_30, %c0_31] : memref<256x4xbf16, #tpu.memory_space<vmem>>, vector<256x4xbf16>
      tpu.vector_store %arg10[%c0_30, %c0_31], %46 {strides = array<i32>} : memref<256x4xbf16, #tpu.memory_space<vmem>>, vector<256x4xbf16>,
    } else {
    }
    %c0 = arith.constant 0 : index
    %c0_1 = arith.constant 0 : index
    %c0_2 = arith.constant 0 : index
    %3 = vector.load %arg2[%c0, %c0_1, %c0_2] : memref<1x128x128xf32, #tpu.memory_space<vmem>>, vector<1x128x128xf32>
    %4 = vector.shape_cast %3 : vector<1x128x128xf32> to vector<128x128xf32>
    %5 = arith.truncf %4 : vector<128x128xf32> to vector<128x128xbf16>
    %c0_3 = arith.constant 0 : index
    %c0_4 = arith.constant 0 : index
    %6 = vector.load %arg4[%c0_3, %c0_4] : memref<128x4xbf16, #tpu.memory_space<vmem>>, vector<128x4xbf16>
    %cst = arith.constant dense<0.000000e+00> : vector<128x4xf32>
    %7 = tpu.matmul %5, %6, %cst {dimension_numbers = #tpu.dot_dimension_numbers<[1], [0], [0], [1], [0, 0, 1, 1], [], []>} : vector<128x128xbf16>, vector<128x4xbf16>, vector<128x4xf32> -> vector<128x4xf32>
    %c0_5 = arith.constant 0 : index
    %c0_6 = arith.constant 0 : index
    %8 = vector.load %arg5[%c0_5, %c0_6] : memref<1x4xf32, #tpu.memory_space<vmem>>, vector<1x4xf32>
    %9 = vector.broadcast %8 : vector<1x4xf32> to vector<128x4xf32>
    %10 = arith.addf %7, %9 : vector<128x4xf32>
    %11 = arith.truncf %10 : vector<128x4xf32> to vector<128x4xbf16>
    %c0_7 = arith.constant 0 : index
    %c0_8 = arith.constant 0 : index
    %12 = vector.load %arg10[%c0_7, %c0_8] : memref<256x4xbf16, #tpu.memory_space<vmem>>, vector<256x4xbf16>
    %cst_9 = arith.constant dense<0.000000e+00> : vector<128x256xf32>
    %13 = tpu.matmul %11, %12, %cst_9 {dimension_numbers = #tpu.dot_dimension_numbers<[1], [1], [0], [0], [0, 0, 1, 0], [], []>} : vector<128x4xbf16>, vector<256x4xbf16>, vector<128x256xf32> -> vector<128x256xf32>
    %cst_10 = arith.constant dense<0xFF800000> : vector<128xf32>
    %14 = vector.multi_reduction <maximumf>, %13, %cst_10 [1] : vector<128x256xf32> to vector<128xf32>
    %15 = vector.shape_cast %14 : vector<128xf32> to vector<128x1xf32>
    %16 = vector.broadcast %15 : vector<128x1xf32> to vector<128x256xf32>
    %17 = arith.subf %13, %16 : vector<128x256xf32>
    %18 = math.exp %17 : vector<128x256xf32>
    %cst_11 = arith.constant dense<0.000000e+00> : vector<128xf32>
    %19 = vector.multi_reduction <add>, %18, %cst_11 [1] : vector<128x256xf32> to vector<128xf32>
    %20 = vector.shape_cast %19 : vector<128xf32> to vector<128x1xf32>
    %21 = tpu.reciprocal %20 {approx = true} : vector<128x1xf32> -> vector<128x1xf32>
    %22 = vector.broadcast %21 : vector<128x1xf32> to vector<128x256xf32>
    %23 = arith.mulf %18, %22 : vector<128x256xf32>
    %24 = arith.truncf %23 : vector<128x256xf32> to vector<128x256xbf16>
    %c0_12 = arith.constant 0 : index
    %c0_13 = arith.constant 0 : index
    %25 = vector.load %arg11[%c0_12, %c0_13] : memref<256x128xbf16, #tpu.memory_space<vmem>>, vector<256x128xbf16>
    %cst_14 = arith.constant dense<0.000000e+00> : vector<128x128xf32>
    %26 = tpu.matmul %24, %25, %cst_14 {dimension_numbers = #tpu.dot_dimension_numbers<[1], [0], [0], [1], [0, 0, 1, 1], [], []>} : vector<128x256xbf16>, vector<256x128xbf16>, vector<128x128xf32> -> vector<128x128xf32>
    %c0_15 = arith.constant 0 : index
    %c0_16 = arith.constant 0 : index
    %27 = memref.load %arg8[%c0_15, %c0_16] : memref<1x1xf32, #tpu.memory_space<smem>>
    %28 = vector.broadcast %27 : f32 to vector<128x128xf32>
    %29 = arith.mulf %28, %26 : vector<128x128xf32>
    %30 = arith.addf %29, %4 : vector<128x128xf32>
    %c0_17 = arith.constant 0 : index
    %c0_18 = arith.constant 0 : index
    %c0_19 = arith.constant 0 : index
    %31 = vector.load %arg9[%c0_17, %c0_18, %c0_19] : memref<1x128x128xf32, #tpu.memory_space<vmem>>, vector<1x128x128xf32>
    %32 = vector.shape_cast %31 : vector<1x128x128xf32> to vector<128x128xf32>
    %33 = vector.shape_cast %30 : vector<128x128xf32> to vector<1x128x128xf32>
    tpu.vector_store %arg9[%c0_17, %c0_18, %c0_19], %33 {strides = array<i32>} : memref<1x128x128xf32, #tpu.memory_space<vmem>>, vector<1x128x128xf32>,
    return
  }
  func.func @transform_0(%arg0: i32, %arg1: i32) -> (i32, i32, i32) {
    %c0_i32 = arith.constant 0 : i32
    %c0_i32_0 = arith.constant 0 : i32
    return %arg0, %arg1, %c0_i32 : i32, i32, i32
  }
  func.func @transform_1(%arg0: i32, %arg1: i32) -> (i32, i32, i32) {
    %c0_i32 = arith.constant 0 : i32
    %c0_i32_0 = arith.constant 0 : i32
    %c0_i32_1 = arith.constant 0 : i32
    return %arg0, %c0_i32, %c0_i32_0 : i32, i32, i32
  }
  func.func @transform_2(%arg0: i32, %arg1: i32) -> (i32, i32) {
    %c0_i32 = arith.constant 0 : i32
    %c0_i32_0 = arith.constant 0 : i32
    %c0_i32_1 = arith.constant 0 : i32
    return %c0_i32, %c0_i32_0 : i32, i32
  }
  func.func @transform_3(%arg0: i32, %arg1: i32) -> (i32, i32) {
    %c0_i32 = arith.constant 0 : i32
    %c0_i32_0 = arith.constant 0 : i32
    %c0_i32_1 = arith.constant 0 : i32
    return %c0_i32, %c0_i32_0 : i32, i32
  }
  func.func @transform_4(%arg0: i32, %arg1: i32) -> (i32, i32) {
    %c0_i32 = arith.constant 0 : i32
    %c0_i32_0 = arith.constant 0 : i32
    %c0_i32_1 = arith.constant 0 : i32
    return %c0_i32, %c0_i32_0 : i32, i32
  }
  func.func @transform_5(%arg0: i32, %arg1: i32) -> (i32, i32) {
    %c0_i32 = arith.constant 0 : i32
    %c0_i32_0 = arith.constant 0 : i32
    %c0_i32_1 = arith.constant 0 : i32
    return %c0_i32, %c0_i32_0 : i32, i32
  }
  func.func @transform_6(%arg0: i32, %arg1: i32) -> (i32, i32) {
    %c0_i32 = arith.constant 0 : i32
    %c0_i32_0 = arith.constant 0 : i32
    %c0_i32_1 = arith.constant 0 : i32
    return %c0_i32, %c0_i32_0 : i32, i32
  }
  func.func @transform_7(%arg0: i32, %arg1: i32) -> (i32, i32, i32) {
    %c0_i32 = arith.constant 0 : i32
    %c0_i32_0 = arith.constant 0 : i32
    return %arg0, %arg1, %c0_i32 : i32, i32, i32
  }
}

</mosaic_0001>

<bundles_post_ra>
// kernel: tpu_custom_call.1
= control target key start
LH: loop header
LB: loop body
LE: loop exit
PB: predicated region body
PF: predicated region fallthrough
CT: control target
= control target key end

     0   :  { %s3634_s0 = inlined_call_operand.hbm [shape: f32[2,256,128], index: 0, kind: input, shape index: {}]   ;;  %s3635_s1 = inlined_call_operand.hbm [shape: f32[2,256,128], index: 1, kind: input, shape index: {}]   ;;  %s3636_s2 = inlined_call_operand.hbm [shape: bf16[128,4], index: 2, kind: input, shape index: {}]   ;;  %s3637_s3 = inlined_call_operand.hbm [shape: f32[1,4], index: 3, kind: input, shape index: {}]   ;;  %s3638_s4 = inlined_call_operand.hbm [shape: bf16[128,132], index: 4, kind: input, shape index: {}]   ;;  %s3639_s5 = inlined_call_operand.hbm [shape: f32[1,132], index: 5, kind: input, shape index: {}]   ;;  %s3640_s6 = inlined_call_operand.<no memory space> [shape: f32[1,1], index: 6, kind: input, shape index: {}]   ;;  %s3641_s7 = inlined_call_operand.hbm [shape: f32[2,256,128], index: 7, kind: output, shape index: {}]  }
   0x1   :  { %3656 = sst [smem:[#allocation27_spill]] %s3634_s0 }
   0x2   :  { %3657 = sst [smem:[#allocation28_spill]] %s3636_s2 }
   0x3   :  { %3658 = sst [smem:[#allocation29_spill]] %s3637_s3 }
   0x4   :  { %3659 = sst [smem:[#allocation30_spill]] %s3638_s4 }
   0x5   :  { %3660 = sst [smem:[#allocation31_spill]] %s3639_s5 }
   0x6   :  { %3661 = sst [smem:[#allocation32_spill]] %s3641_s7 }
   0x7   :  { %12 = sst [smem:[#allocation4]] %s3640_s6 }
   0x8   :  { %13 = vsyncpa [#allocation6], 0 }
   0x9   :  { %15 = vsyncpa [#allocation6 + $0x1], 0 }
   0xa   :  { %16 = vsyncpa [#allocation9], 0 }
   0xb   :  { %18 = vsyncpa [#allocation9 + $0x1], 0 }
   0xc   :  { %19 = vsyncpa [#allocation12], 0 }
   0xd   :  { %20 = vsyncpa [#allocation15], 0 }
   0xe   :  { %21 = vsyncpa [#allocation7], 0 }
   0xf   :  { %23 = vsyncpa [#allocation7 + $0x1], 0  ;;  %s2719_s26 = smov 0   ;;  %s2721_s27 = smov 0  }
  0x10   :  { %s2723_s28 = smov 0   ;;  %s2725_s29 = smov 0  }
  0x11   :  { %s2727_s30 = smov 0   ;;  %s2729_s8 = smov 0  }
  0x12   :  { %s2731_s6 = smov 0   ;;  %s2733_s9 = smov 0  }
  0x13   :  { %s2735_s10 = smov 0   ;;  %s2737_s11 = smov 0  }
  0x14   :  { %s2739_s12 = smov 0  }
  0x15 LB: > { %3662 = sst [smem:[#allocation23_spill]] %s2644_s6  ;;  %s2773_s13 = sadd.s32 4294967295, %s2660_s12   ;;  %s2660_s12 = sphi %s2739_s12, %s29_s12   ;;  %s2656_s11 = sphi %s2737_s11, %s3714_s11   ;;  %s2652_s10 = sphi %s2735_s10, %s3713_s10   ;;  %s2648_s9 = sphi %s2733_s9, %s3712_s9   ;;  %s2644_s6 = sphi %s2731_s6, %s3711_s6   ;;  %s2640_s8 = sphi %s2729_s8, %s3710_s8   ;;  %s2636_s30 = sphi %s2727_s30, %s3709_s30   ;;  %s2632_s29 = sphi %s2725_s29, %s3708_s29   ;;  %s2628_s28 = sphi %s2723_s28, %s3707_s28   ;;  %s2624_s27 = sphi %s2721_s27, %s3706_s27   ;;  %s2620_s26 = sphi %s2719_s26, %s3705_s26  }
  0x16   : > { %3663 = sst [smem:[#allocation24_spill]] %s2648_s9  ;;  %p89_p0 = scmp.ne.s32.totalorder %s2624_s27, %s2620_s26 }
  0x17   : > { %p3642_p1 = scmp.eq.s32.totalorder %s2773_s13, 0  ;;  %p1821_p3 = scmp.ge.s32.totalorder %s2660_s12, 1 }
  0x18   : > { %p233_p4 = scmp.lt.s32.totalorder %s2660_s12, 5  ;;  %s2662_s16 = smov [#allocation10]  }
  0x19   : > { %p2782_p5 = por %p89_p0, %p3642_p1  ;;  %s245_s17 = sshll.u32 %s2662_s16, 4  ;;  %s246_s17 = int_to_ptr.vmem [resolvable:$true] %s245_s17 }
  0x1a   : > { %p2786_p6 = pnand %p1821_p3, %p233_p4  ;;  %s2663_s19 = smov [#allocation11]  }
  0x1b   : > { %s3664_s14 = scalar_select %p2782_p5, 1, 0 }
  0x1c   : > { %s3666_s15 = scalar_select %p2786_p6, 1, 0 }
  0x1d   : > { %3665 = sst [smem:[#allocation25_spill]] %s3664_s14  ;;  %p2073_p7 = pneg %p2786_p6 }
  0x1e   : > { %s259_s20 = sshll.u32 %s2663_s19, 4  ;;  %s3668_s2 = sld [smem:[#allocation28_spill]]  ;;  %s2798_s20 = int_to_ptr.vmem [resolvable:$true] %s259_s20 }
  0x1f   : > { %p2794_p8 = pnand %p2073_p7, %p3642_p1 }
  0x21   : > { %p2808_p10 = pneg %p2794_p8 }
  0x24   : > { %s2350_s23 = scalar_lea.hbm %s3668_s2, 1024 }
  0x25   : > { %p2351_p9 = scmp.ne.s32.totalorder %s3668_s2, %s2350_s23  ;;  %p2357_p13 = scmp.lt.u32.totalorder %s2350_s23, %s3668_s2 }
  0x27   : > { %p2353_p11 = pnand %p2808_p10, %p2351_p9 }
  0x29   : > { %p2354_p12 = pneg %p2353_p11 }
  0x2b   : > { %p2359_p0 = pnand %p2357_p13, %p2354_p12 }
  0x2d   : > { %2362 = shalt.err (!%p2359_p0)
}
  0x2e   : > { %s2363_s21 = scalar_lea.vmem %s246_s17, 1024  ;;  %p2371_p1 = scmp.lt.s32.totalorder %s246_s17, %s246_s17 }
  0x2f   : > { %p2364_p3 = scmp.ne.s32.totalorder %s246_s17, %s2363_s21  ;;  %p2372_p2 = scmp.lt.s32.totalorder %s2363_s21, %s2363_s21 }
  0x31   : > { %p2366_p4 = pnand %p2364_p3, %p2808_p10  ;;  %p2373_p5 = por %p2372_p2, %p2371_p1 }
  0x33   : > { %p2367_p7 = pneg %p2366_p4 }
  0x35   : > { %p2374_p6 = pnand %p2373_p5, %p2367_p7 }
  0x37   : > { %2377 = shalt.err (!%p2374_p6)
}
  0x38   : > { %s2664_s22 = smov 64   ;;  %s2665_s24 = smov 4  }
  0x39   : > { %2076 = dma.hbm_to_vmem [thread:$0]  (!%p2794_p8), %s3668_s2, 1024, %s246_s17, [#allocation9], %s2664_s22, %s2664_s22, %s2665_s24  }
  0x3a   : > { %s3670_s3 = sld [smem:[#allocation29_spill]] }
  0x40   : > { %s2378_s7 = scalar_lea.hbm %s3670_s3, 16 }
  0x41   : > { %p2379_p9 = scmp.ne.s32.totalorder %s3670_s3, %s2378_s7  ;;  %p2385_p5 = scmp.lt.u32.totalorder %s2378_s7, %s3670_s3 }
  0x43   : > { %p2381_p1 = pnand %p2379_p9, %p2808_p10 }
  0x45   : > { %p2382_p2 = pneg %p2381_p1 }
  0x47   : > { %p2387_p6 = pnand %p2385_p5, %p2382_p2 }
  0x49   : > { %2390 = shalt.err (!%p2387_p6)
}
  0x4a   : > { %s2391_s17 = scalar_lea.vmem %s2798_s20, 16  ;;  %s2398_s6 = scalar_lea.vmem %s2798_s20, 32 }
  0x4b   : > { %p2392_p11 = scmp.ne.s32.totalorder %s2798_s20, %s2391_s17  ;;  %p2399_p0 = scmp.lt.s32.totalorder %s2798_s20, %s2798_s20 }
  0x4c   : > { %p2400_p3 = scmp.lt.s32.totalorder %s2398_s6, %s2391_s17 }
  0x4d   : > { %p2394_p12 = pnand %p2392_p11, %p2808_p10 }
  0x4e   : > { %p2401_p4 = por %p2400_p3, %p2399_p0 }
  0x4f   : > { %p2395_p13 = pneg %p2394_p12 }
  0x51   : > { %p2402_p7 = pnand %p2401_p4, %p2395_p13 }
  0x53   : > { %2405 = shalt.err (!%p2402_p7)
}
  0x54   : > { %2079 = dma.hbm_to_vmem [thread:$0]  (!%p2794_p8), %s3670_s3, 16, %s2798_s20, [#allocation12]  }
  0x55   : > { %s2666_s14 = smov [#allocation13]   ;;  %s3671_s4 = sld [smem:[#allocation30_spill]] }
  0x56   : > { %s269_s22 = sshll.u32 %s2666_s14, 4  ;;  %s270_s22 = int_to_ptr.vmem [resolvable:$true] %s269_s22 }
  0x5b   : > { %s2406_s23 = scalar_lea.hbm %s3671_s4, 2048 }
  0x5c   : > { %p2407_p9 = scmp.ne.s32.totalorder %s3671_s4, %s2406_s23  ;;  %p2413_p5 = scmp.lt.u32.totalorder %s2406_s23, %s3671_s4 }
  0x5e   : > { %p2409_p1 = pnand %p2407_p9, %p2808_p10 }
  0x60   : > { %p2410_p2 = pneg %p2409_p1 }
  0x62   : > { %p2415_p6 = pnand %p2413_p5, %p2410_p2 }
  0x64   : > { %2418 = shalt.err (!%p2415_p6)
}
  0x65   : > { %s2419_s20 = scalar_lea.vmem %s270_s22, 2048  ;;  %p2427_p0 = scmp.lt.s32.totalorder %s270_s22, %s270_s22 }
  0x66   : > { %p2420_p11 = scmp.ne.s32.totalorder %s270_s22, %s2419_s20  ;;  %p2428_p3 = scmp.lt.s32.totalorder %s2419_s20, %s2419_s20 }
  0x68   : > { %p2422_p12 = pnand %p2420_p11, %p2808_p10  ;;  %p2429_p4 = por %p2428_p3, %p2427_p0 }
  0x6a   : > { %p2423_p13 = pneg %p2422_p12 }
  0x6c   : > { %p2430_p7 = pnand %p2429_p4, %p2423_p13 }
  0x6e   : > { %2433 = shalt.err (!%p2430_p7)
}
  0x6f   : > { %s3648_s6 = smov 128   ;;  %s3650_s7 = smov 8  }
  0x70   : > { %2082 = dma.hbm_to_vmem [thread:$0]  (!%p2794_p8), %s3671_s4, 2048, %s270_s22, [#allocation12], %s3648_s6, %s3648_s6, %s3650_s7  }
  0x71   : > { %s2669_s24 = smov [#allocation14]   ;;  %s3672_s5 = sld [smem:[#allocation31_spill]] }
  0x72   : > { %s283_s25 = sshll.u32 %s2669_s24, 4  ;;  %s284_s25 = int_to_ptr.vmem [resolvable:$true] %s283_s25 }
  0x77   : > { %s2434_s19 = scalar_lea.hbm %s3672_s5, 32 }
  0x78   : > { %p2435_p9 = scmp.ne.s32.totalorder %s3672_s5, %s2434_s19  ;;  %p2441_p5 = scmp.lt.u32.totalorder %s2434_s19, %s3672_s5 }
  0x7a   : > { %p2437_p1 = pnand %p2435_p9, %p2808_p10 }
  0x7c   : > { %p2438_p2 = pneg %p2437_p1 }
  0x7e   : > { %p2443_p6 = pnand %p2441_p5, %p2438_p2 }
  0x80   : > { %2446 = shalt.err (!%p2443_p6)
}
  0x81   : > { %s2447_s22 = scalar_lea.vmem %s284_s25, 32  ;;  %p2455_p0 = scmp.lt.s32.totalorder %s284_s25, %s284_s25 }
  0x82   : > { %p2448_p11 = scmp.ne.s32.totalorder %s284_s25, %s2447_s22  ;;  %p2456_p3 = scmp.lt.s32.totalorder %s2447_s22, %s2447_s22 }
  0x84   : > { %p2450_p12 = pnand %p2448_p11, %p2808_p10  ;;  %p2457_p4 = por %p2456_p3, %p2455_p0 }
  0x86   : > { %p2451_p13 = pneg %p2450_p12 }
  0x88   : > { %p2458_p7 = pnand %p2457_p4, %p2451_p13 }
  0x8a   : > { %2461 = shalt.err (!%p2458_p7)
}
  0x8b   : > { %2085 = dma.hbm_to_vmem [thread:$0]  (!%p2794_p8), %s3672_s5, 32, %s284_s25, [#allocation15]  }
  0x8c   : > { %s1820_s2 = sadd.s32 4294967294, %s2660_s12   ;;  %s38_s18 = sadd.s32 1, %s2652_s10 }
  0x8d   : > { %s41_s26 = sadd.s32 1, %s2656_s11  ;;  %p39_p10 = scmp.ge.s32.totalorder %s38_s18, 2 }
  0x8e   : > { %s50_s24 = sadd.s32 1, %s2640_s8  ;;  %p57_p9 = scmp.ne.s32.totalorder %s2640_s8, %s2636_s30 }
  0x8f   : > { %p3654_p1 = scmp.eq.s32.totalorder %s2660_s12, 0  ;;  %s3716_s18 = smov (%p39_p10, %s38_s18), 0 }
  0x90   : > { %s3718_s26 = smov (!%p39_p10, %s41_s26), %s2656_s11  ;;  %s46_s23 = ssub.s32 %s2652_s10, %s3716_s18 }
  0x91   : > { %p2901_p2 = por %p3654_p1, %p57_p9  ;;  %p43_p8 = scmp.ge.s32.totalorder %s3718_s26, 2 }
  0x92   : > { %p63_p5 = scmp.ne.s32.totalorder %s2636_s30, %s2632_s29  ;;  %p3674_p6 = scmp.eq.s32.totalorder %s2773_s13, 3 }
  0x93   : > { %p226_p12 = scmp.eq.s32.totalorder %s1820_s2, 3  ;;  %s3720_s26 = smov (%p43_p8, %s3718_s26), 0 }
  0x94   : > { %p2909_p11 = por %p3674_p6, %p57_p9  ;;  %3676 = sst [smem:[#allocation26_spill]] %s3720_s26 }
  0x95   : > { %p3677_p13 = scmp.eq.s32.totalorder %s2773_s13, 0  ;;  %p2921_p3 = por %p226_p12, %p63_p5 }
  0x96   : > { %s3675_s16 = scalar_select %p2909_p11, 1, 0 }
  0x97   : > { %p2917_p0 = por %p3677_p13, %p63_p5  ;;  %s2927_s17 = ssub.s32 %s2656_s11, %s3720_s26 }
  0x98   : > { %s3679_s21 = scalar_select %p2921_p3, 1, 0 }
  0x99   : > { %p3653_p4 = scmp.lt.s32.totalorder %s2660_s12, 4  ;;  %s47_s20 = sor.u32 %s46_s23, %s2927_s17 }
  0x9a   : > { %p48_p10 = scmp.eq.s32.totalorder %s47_s20, 0  ;;  %s297_s22 = sand.u32 1, %s2640_s8  }
  0x9b   : > { %s1827_s9 = sshll.u32 %s297_s22, 7  ;;  %s1828_s2 = sshll.u32 %s2652_s10, 4 }
  0x9c   : > { %s2934_s14 = scalar_select %p48_p10, %s2640_s8, %s50_s24  }
  0x9d   : > { %s1829_s6 = sshll.u32 %s2656_s11, 5  ;;  %s301_s7 = scalar_lea.vmem [#allocation5], %s1827_s9 }
  0x9e   : > { %s310_s3 = sshll.u32 %s301_s7, 4  ;;  %s307_s4 = sadd.s32 %s1829_s6, %s1828_s2  ;;  %s2938_s3 = int_to_ptr.vmem [resolvable:$true] %s310_s3 }
  0x9f   : > { %s1830_s5 = sshll.u32 %s307_s4, 7  ;;  %p2944_p9 = pnand %p3653_p4, %p2901_p2 }
  0xa0   : > { %s3681_s0 = sld [smem:[#allocation27_spill]]  ;;  %s2953_s6 = scalar_lea.sflag [#allocation6], %s297_s22 }
  0xa1   : > { %p2464_p2 = pneg %p2944_p9 }
  0xa6   : > { %s2951_s24 = scalar_lea.hbm %s3681_s0, %s1830_s5  ;;  %s2467_s9 = scalar_lea.hbm %s3681_s0, 8192 }
  0xa7   : > { %s2462_s4 = scalar_lea.hbm %s2951_s24, 2048  ;;  %p2468_p12 = scmp.lt.u32.totalorder %s2951_s24, %s3681_s0 }
  0xa8   : > { %p2463_p8 = scmp.ne.s32.totalorder %s2951_s24, %s2462_s4  ;;  %p2469_p13 = scmp.lt.u32.totalorder %s2467_s9, %s2462_s4 }
  0xa9   : > { %p2471_p4 = scmp.lt.u32.totalorder %s2462_s4, %s2951_s24 }
  0xaa   : > { %p2465_p5 = pnand %p2464_p2, %p2463_p8  ;;  %p2470_p10 = por %p2469_p13, %p2468_p12 }
  0xac   : > { %p2466_p6 = pneg %p2465_p5  ;;  %p2472_p1 = por %p2471_p4, %p2470_p10 }
  0xae   : > { %p2473_p7 = pnand %p2472_p1, %p2466_p6 }
  0xb0   : > { %2476 = shalt.err (!%p2473_p7)
}
  0xb1   : > { %s2477_s22 = scalar_lea.vmem %s2938_s3, 2048  ;;  %s2670_s23 = smov [#allocation5]  }
  0xb2   : > { %p2478_p8 = scmp.ne.s32.totalorder %s2938_s3, %s2477_s22  ;;  %s2482_s20 = sshll.u32 %s2670_s23, 4  ;;  %s2483_s20 = int_to_ptr.vmem [resolvable:$false] %s2482_s20 }
  0xb3   : > { %s2484_s7 = scalar_lea.vmem %s2483_s20, 4096  ;;  %p2485_p11 = scmp.lt.s32.totalorder %s2938_s3, %s2483_s20 }
  0xb4   : > { %p2480_p5 = pnand %p2478_p8, %p2464_p2  ;;  %p2486_p12 = scmp.lt.s32.totalorder %s2484_s7, %s2477_s22 }
  0xb6   : > { %p2481_p3 = pneg %p2480_p5  ;;  %p2487_p13 = por %p2486_p12, %p2485_p11 }
  0xb8   : > { %p2488_p4 = pnand %p2487_p13, %p2481_p3 }
  0xba   : > { %2491 = shalt.err (!%p2488_p4)
}
  0xbb   : > { %s3682_s4 = smov 8   ;;  %s3683_s25 = smov 128  }
  0xbc   : > { %2089 = dma.hbm_to_vmem [thread:$0]  (!%p2944_p9), %s2951_s24, 2048, %s2938_s3, %s2953_s6, %s3683_s25, %s3683_s25, %s3682_s4  }
  0xbd   : > { %s76_s9 = sadd.s32 1, %s2628_s28  ;;  %p83_p1 = scmp.ne.s32.totalorder %s2628_s28, %s2624_s27 }
  0xbe   : > { %p3684_p11 = scmp.eq.s32.totalorder %s2927_s17, 0  ;;  %p3685_p3 = scmp.eq.s32.totalorder %s2660_s12, 0 }
  0xbf   : > { %s320_s5 = sand.u32 1, %s2660_s12   ;;  %s322_s2 = sand.u32 1, %s2628_s28  }
  0xc0   : > { %s2990_s26 = scalar_select %p3684_p11, %s2628_s28, %s76_s9  }
  0xc1   : > { %p85_p7 = por %p83_p1, %p3685_p3  ;;  %s1831_s22 = sshll.u32 %s322_s2, 8 }
  0xc2   : > { %s1882_s23 = sshll.u32 %s2656_s11, 12  ;;  %s324_s3 = scalar_lea.vmem [#allocation8], %s1831_s22 }
  0xc3   : > { %s3000_s0 = scalar_lea.hbm %s3635_s1, %s1882_s23  ;;  %s331_s24 = sshll.u32 %s324_s3, 4  ;;  %s3008_s24 = int_to_ptr.vmem [resolvable:$true] %s331_s24 }
  0xc4   : > { %p3686_p9 = scmp.lt.s32.totalorder %s2660_s12, 4  ;;  %s3010_s6 = scalar_lea.sflag [#allocation9], %s320_s5 }
  0xc5   : > { %s2492_s9 = scalar_lea.hbm %s3000_s0, 4096  ;;  %s2497_s23 = scalar_lea.hbm %s3635_s1, 8192 }
  0xc6   : > { %p3004_p2 = pnand %p3686_p9, %p85_p7  ;;  %p2493_p6 = scmp.ne.s32.totalorder %s3000_s0, %s2492_s9 }
  0xc7   : > { %p2498_p12 = scmp.lt.u32.totalorder %s3000_s0, %s3635_s1  ;;  %p2499_p13 = scmp.lt.u32.totalorder %s2497_s23, %s2492_s9 }
  0xc8   : > { %p2494_p10 = pneg %p3004_p2  ;;  %p2501_p1 = scmp.lt.u32.totalorder %s2492_s9, %s3000_s0 }
  0xc9   : > { %p2500_p4 = por %p2499_p13, %p2498_p12 }
  0xca   : > { %p2495_p8 = pnand %p2494_p10, %p2493_p6 }
  0xcb   : > { %p2502_p11 = por %p2501_p1, %p2500_p4 }
  0xcc   : > { %p2496_p5 = pneg %p2495_p8 }
  0xce   : > { %p2503_p3 = pnand %p2502_p11, %p2496_p5 }
  0xd0   : > { %2506 = shalt.err (!%p2503_p3)
}
  0xd1   : > { %s2507_s5 = scalar_lea.vmem %s3008_s24, 4096  ;;  %s2671_s3 = smov [#allocation8]  }
  0xd2   : > { %p2508_p7 = scmp.ne.s32.totalorder %s3008_s24, %s2507_s5  ;;  %s2512_s2 = sshll.u32 %s2671_s3, 4  ;;  %s2513_s2 = int_to_ptr.vmem [resolvable:$false] %s2512_s2 }
  0xd3   : > { %s2514_s22 = scalar_lea.vmem %s2513_s2, 8192  ;;  %p2515_p8 = scmp.lt.s32.totalorder %s3008_s24, %s2513_s2 }
  0xd4   : > { %p2510_p9 = pnand %p2508_p7, %p2494_p10  ;;  %p2516_p12 = scmp.lt.s32.totalorder %s2514_s22, %s2507_s5 }
  0xd6   : > { %p2511_p6 = pneg %p2510_p9  ;;  %p2517_p13 = por %p2516_p12, %p2515_p8 }
  0xd8   : > { %p2518_p4 = pnand %p2517_p13, %p2511_p6 }
  0xda   : > { %2521 = shalt.err (!%p2518_p4)
}
  0xdb   : > { %2092 = dma.hbm_to_vmem [thread:$0]  (!%p3004_p2), %s3000_s0, 4096, %s3008_s24, %s3010_s6, %s3683_s25, %s3683_s25, %s3682_s4  }
  0xdc   : > { %p3688_p10 = scmp.ne.s32.totalorder %s3666_s15, 0 }
  0xdd   : > { %s3044_s9 = sand.u32 (!%p3688_p10), 1, %s2636_s30  }
  0xde   : > { %343 = sbr.rel (%p3688_p10) target bundleno = 1648 (0x670), region = 48  ;;  %s1835_s23 = sshll.u32 (!%p3688_p10), %s3044_s9, 7 }
  0xdf   : > { %s346_s20 = scalar_lea.sflag (!%p3688_p10), [#allocation6], %s3044_s9  ;;  %s3048_s7 = scalar_lea.vmem (!%p3688_p10), [#allocation5], %s1835_s23 }
  0xe5   : > { %2595 = dma.done.wait (%p2917_p0), %s346_s20, 2048  }
  0xe6   : > { %2597 = vsyncadd (%p2917_p0), %s346_s20, 4294965248  ;;  %s3689_s0 = sld [smem:[#allocation25_spill]]  ;;  %s354_s15 = sand.u32 1, %s2773_s13  }
  0xe7   : > { %s356_s4 = sand.u32 1, %s2624_s27   ;;  %s355_s24 = scalar_lea.sflag [#allocation9], %s354_s15 }
  0xe8   : > { %s1836_s25 = sshll.u32 %s356_s4, 8 }
  0xe9   : > { %s3056_s17 = scalar_lea.vmem [#allocation8], %s1836_s25 }
  0xec   : > { %p3690_p2 = scmp.ne.s32.totalorder %s3689_s0, 0 }
  0xee   : > { %2599 = dma.done.wait (%p3690_p2), %s355_s24, 4096  }
  0xef   : > { %2601 = vsyncadd (%p3690_p2), %s355_s24, 4294963200  ;;  %p3691_p5 = scmp.eq.s32.totalorder %s2773_s13, 0 }
  0xf1   : > { %2603 = dma.done.wait (%p3691_p5), [#allocation9], 1024   ;;  %p3692_p1 = pmov %p3691_p5 }
  0xf3   : > { %2605 = vsyncadd (%p3692_p1), [#allocation9], 4294966272  ;;  %p3693_p0 = pmov %p3692_p1 }
  0xf5   : > { %2607 = dma.done.wait (%p3693_p0), [#allocation12], 2064   ;;  %p3694_p11 = pmov %p3693_p0 }
  0xf6   : > { %p3695_p3 = pmov %p3693_p0 }
  0xf7   : > { %2609 = vsyncadd (%p3694_p11), [#allocation12], 4294965232 }
  0xf8   : > { %2611 = dma.done.wait (%p3695_p3), [#allocation15], 32   ;;  %p3696_p7 = pmov %p3693_p0 }
  0xf9   : > { %s3074_s19 = scalar_lea.vmem [#allocation16], %s1835_s23  ;;  %s3697_s6 = sld [smem:[#allocation23_spill]] }
  0xfa   : > { %2613 = vsyncadd (%p3696_p7), [#allocation15], 4294967264 }
  0xff   : > { %p1842_p9 = scmp.ne.s32.totalorder %s3697_s6, 0 }
 0x100   : > { %v2206_v0 = vld [vmem:[#allocation13 + $0x4] ss:$8 sps:$4 sm:$0xff] (!%p1842_p9)   ;;  %v2208_v1 = vld [vmem:[#allocation13] ss:$8 sps:$4 sm:$0xff] (!%p1842_p9)   ;;  %v2672_v2 = vmov (!%p1842_p9), 0   ;;  %v420_v24 = vld [vmem:[%s3056_s17 + $0x18] sm:$0xff] (!%p1842_p9) }
 0x101   : > { %416 = sbr.rel (%p1842_p9) target bundleno = 566 (0x236), region = 76  ;;  %605 = vmatprep.mubr.bf16.mxu0 (!%p1842_p9), %v2672_v2  ;;  %685 = vmatprep.mubr.bf16.mxu1 (!%p1842_p9), %v2672_v2  ;;  %v2209_v3 = vld [vmem:[#allocation13 + $0x14] ss:$8 sps:$4 sm:$0xff] (!%p1842_p9)   ;;  %v2211_v4 = vld [vmem:[#allocation13 + $0x10] ss:$8 sps:$4 sm:$0xff] (!%p1842_p9)   ;;  %v418_v18 = vld [vmem:[%s3056_s17 + $0x8] sm:$0xff] (!%p1842_p9) }
 0x102   : > { %573 = vmatprep.subr.bf16.mxu0 (!%p1842_p9), %v2206_v0  ;;  %2027 = vmatprep.subr.bf16.mxu1 (!%p1842_p9), %v2206_v0  ;;  %v2212_v5 = vld [vmem:[#allocation13 + $0x24] ss:$8 sps:$4 sm:$0xff] (!%p1842_p9)   ;;  %v2214_v6 = vld [vmem:[#allocation13 + $0x20] ss:$8 sps:$4 sm:$0xff] (!%p1842_p9)   ;;  %v2215_v7 = vld [vmem:[#allocation13 + $0x34] ss:$8 sps:$4 sm:$0xff] (!%p1842_p9)  }
 0x103   : > { %574 = vmatpush1.bf16.msra.mxu0 (!%p1842_p9), %v2208_v1  ;;  %2035 = vmatpush1.bf16.msra.mxu1 (!%p1842_p9), %v2208_v1  ;;  %v2217_v8 = vld [vmem:[#allocation13 + $0x30] ss:$8 sps:$4 sm:$0xff] (!%p1842_p9)   ;;  %v2218_v9 = vld [vmem:[#allocation13 + $0x44] ss:$8 sps:$4 sm:$0xff] (!%p1842_p9)   ;;  %v2220_v10 = vld [vmem:[#allocation13 + $0x40] ss:$8 sps:$4 sm:$0xff] (!%p1842_p9)   ;;  %v483_v1 = vlaneseq (!%p1842_p9) }
 0x104   : > { %575 = vmatprep.subr.bf16.mxu0 (!%p1842_p9), %v2209_v3  ;;  %2028 = vmatprep.subr.bf16.mxu1 (!%p1842_p9), %v2209_v3  ;;  %v2221_v11 = vld [vmem:[#allocation13 + $0x54] ss:$8 sps:$4 sm:$0xff] (!%p1842_p9)   ;;  %v2223_v12 = vld [vmem:[#allocation13 + $0x50] ss:$8 sps:$4 sm:$0xff] (!%p1842_p9)   ;;  %v2224_v13 = vld [vmem:[#allocation13 + $0x64] ss:$8 sps:$4 sm:$0xff] (!%p1842_p9)  }
 0x105   : > { %v2226_v14 = vld [vmem:[#allocation13 + $0x60] ss:$8 sps:$4 sm:$0xff] (!%p1842_p9)   ;;  %v2227_v15 = vld [vmem:[#allocation13 + $0x74] ss:$8 sps:$4 sm:$0xff] (!%p1842_p9)   ;;  %v2229_v16 = vld [vmem:[#allocation13 + $0x70] ss:$8 sps:$4 sm:$0xff] (!%p1842_p9)  }
 0x106   : > { %v417_v17 = vld [vmem:[%s3056_s17] sm:$0xff] (!%p1842_p9)  ;;  %v434_v20 = vld [vmem:[%s3056_s17 + $0x88] sm:$0xff] (!%p1842_p9)  ;;  %v419_v23 = vld [vmem:[%s3056_s17 + $0x10] sm:$0xff] (!%p1842_p9)  ;;  %v484_v3 = vshrl.u32 (!%p1842_p9), %v483_v1, 7  ;;  %vm814_vm0 = vcmask (!%p1842_p9), 31744  }
 0x107   : > { %576 = vmatpush1.bf16.msra.mxu0 (!%p1842_p9), %v2211_v4  ;;  %2036 = vmatpush1.bf16.msra.mxu1 (!%p1842_p9), %v2211_v4  ;;  %v433_v19 = vld [vmem:[%s3056_s17 + $0x80] sm:$0xff] (!%p1842_p9)  ;;  %v449_v21 = vpack.c.bf16 (!%p1842_p9), %v418_v18, %v417_v17  ;;  %v435_v25 = vld [vmem:[%s3056_s17 + $0x90] sm:$0xff] (!%p1842_p9)  ;;  %v436_v26 = vld [vmem:[%s3056_s17 + $0x98] sm:$0xff] (!%p1842_p9)  ;;  %v450_v27 = vpack.c.bf16 (!%p1842_p9), %v420_v24, %v419_v23 }
 0x108   : > { %577 = vmatprep.subr.bf16.mxu0 %v2212_v5  ;;  %2029 = vmatprep.subr.bf16.mxu1 %v2212_v5  ;;  %v457_v22 = vpack.c.bf16 %v434_v20, %v433_v19  ;;  %v458_v28 = vpack.c.bf16 %v436_v26, %v435_v25  ;;  %v421_v29 = vld [vmem:[%s3056_s17 + $0x20] sm:$0xff]  ;;  %v422_v30 = vld [vmem:[%s3056_s17 + $0x28] sm:$0xff]  ;;  %v423_v35 = vld [vmem:[%s3056_s17 + $0x30] sm:$0xff]  ;;  %v485_v4 = vsub.s32 0, %v484_v3 }
 0x109   : > { %v437_v31 = vld [vmem:[%s3056_s17 + $0xa0] sm:$0xff]  ;;  %v438_v32 = vld [vmem:[%s3056_s17 + $0xa8] sm:$0xff]  ;;  %v451_v33 = vpack.c.bf16 %v422_v30, %v421_v29  ;;  %v424_v36 = vld [vmem:[%s3056_s17 + $0x38] sm:$0xff] }
 0x10a   : > { %v459_v34 = vpack.c.bf16 %v438_v32, %v437_v31  ;;  %v439_v37 = vld [vmem:[%s3056_s17 + $0xb0] sm:$0xff]  ;;  %v440_v38 = vld [vmem:[%s3056_s17 + $0xb8] sm:$0xff]  ;;  %v452_v39 = vpack.c.bf16 %v424_v36, %v423_v35  ;;  %v425_v41 = vld [vmem:[%s3056_s17 + $0x40] sm:$0xff] }
 0x10b   : > { %578 = vmatpush1.bf16.msra.mxu0 %v2214_v6  ;;  %2037 = vmatpush1.bf16.msra.mxu1 %v2214_v6  ;;  %v460_v40 = vpack.c.bf16 %v440_v38, %v439_v37  ;;  %v426_v42 = vld [vmem:[%s3056_s17 + $0x48] sm:$0xff]  ;;  %v441_v43 = vld [vmem:[%s3056_s17 + $0xc0] sm:$0xff]  ;;  %v427_v47 = vld [vmem:[%s3056_s17 + $0x50] sm:$0xff]  ;;  %v489_v6 = vsub.s32 1, %v484_v3 }
 0x10c   : > { %579 = vmatprep.subr.bf16.mxu0 %v2215_v7  ;;  %2030 = vmatprep.subr.bf16.mxu1 %v2215_v7  ;;  %v442_v44 = vld [vmem:[%s3056_s17 + $0xc8] sm:$0xff]  ;;  %v453_v45 = vpack.c.bf16 %v426_v42, %v425_v41  ;;  %v428_v48 = vld [vmem:[%s3056_s17 + $0x58] sm:$0xff]  ;;  %v443_v49 = vld [vmem:[%s3056_s17 + $0xd0] sm:$0xff] }
 0x10d   : > { %v461_v46 = vpack.c.bf16 %v442_v44, %v441_v43  ;;  %v444_v50 = vld [vmem:[%s3056_s17 + $0xd8] sm:$0xff]  ;;  %v454_v51 = vpack.c.bf16 %v428_v48, %v427_v47  ;;  %v429_v53 = vld [vmem:[%s3056_s17 + $0x60] sm:$0xff]  ;;  %v430_v54 = vld [vmem:[%s3056_s17 + $0x68] sm:$0xff] }
 0x10e   : > { %v462_v52 = vpack.c.bf16 %v444_v50, %v443_v49  ;;  %v445_v55 = vld [vmem:[%s3056_s17 + $0xe0] sm:$0xff]  ;;  %v446_v56 = vld [vmem:[%s3056_s17 + $0xe8] sm:$0xff]  ;;  %v455_v57 = vpack.c.bf16 %v430_v54, %v429_v53  ;;  %v431_v59 = vld [vmem:[%s3056_s17 + $0x70] sm:$0xff] }
 0x10f   : > { %580 = vmatpush1.bf16.msra.mxu0 %v2217_v8  ;;  %2038 = vmatpush1.bf16.msra.mxu1 %v2217_v8  ;;  %v463_v58 = vpack.c.bf16 %v446_v56, %v445_v55  ;;  %v432_v60 = vld [vmem:[%s3056_s17 + $0x78] sm:$0xff]  ;;  %v447_v61 = vld [vmem:[%s3056_s17 + $0xf0] sm:$0xff]  ;;  %v481_v5 = vld [vmem:[#allocation14] sm:$0x3] }
 0x110   : > { %581 = vmatprep.subr.bf16.mxu0 %v2218_v9  ;;  %2031 = vmatprep.subr.bf16.mxu1 %v2218_v9  ;;  %v448_v62 = vld [vmem:[%s3056_s17 + $0xf8] sm:$0xff]  ;;  %v456_v63 = vpack.c.bf16 %v432_v60, %v431_v59  ;;  %v3125_v7 = vrot.slane %v481_v5, %v485_v4 }
 0x111   : > { %v464_v0 = vpack.c.bf16 %v448_v62, %v447_v61 }
 0x113   : > { %582 = vmatpush1.bf16.msra.mxu0 %v2220_v10  ;;  %2039 = vmatpush1.bf16.msra.mxu1 %v2220_v10  ;;  %v3127_v10 = vrot.slane %v481_v5, %v489_v6 }
 0x114   : > { %583 = vmatprep.subr.bf16.mxu0 %v2221_v11  ;;  %2032 = vmatprep.subr.bf16.mxu1 %v2221_v11 }
 0x117   : > { %584 = vmatpush1.bf16.msra.mxu0 %v2223_v12  ;;  %2040 = vmatpush1.bf16.msra.mxu1 %v2223_v12 }
 0x118   : > { %585 = vmatprep.subr.bf16.mxu0 %v2224_v13  ;;  %2033 = vmatprep.subr.bf16.mxu1 %v2224_v13 }
 0x11b   : > { %586 = vmatpush1.bf16.msra.mxu0 %v2226_v14  ;;  %2041 = vmatpush1.bf16.msra.mxu1 %v2226_v14 }
 0x11c   : > { %587 = vmatprep.subr.bf16.mxu0 %v2227_v15  ;;  %2034 = vmatprep.subr.bf16.mxu1 %v2227_v15 }
 0x11f   : > { %588 = vmatpush1.bf16.msra.mxu0 %v2229_v16  ;;  %2042 = vmatpush1.bf16.msra.mxu1 %v2229_v16 }
 0x122   : > { %606 = vmatmul.mubr.bf16.vlgmr.msra.gmra.mrb[0].mxu0 %v449_v21  ;;  %686 = vmatmul.mubr.bf16.vlgmr.msra.gmra.mrb[0].mxu1 %v457_v22 }
 0x123   : > { %615 = vmatprep.mubr.bf16.mxu0 %v2672_v2  ;;  %695 = vmatprep.mubr.bf16.mxu1 %v2672_v2 }
 0x12a   : > { %616 = vmatmul.mubr.bf16.gmra.mrb[4].mxu0 %v450_v27  ;;  %696 = vmatmul.mubr.bf16.gmra.mrb[4].mxu1 %v458_v28 }
 0x12b   : > { %625 = vmatprep.mubr.bf16.mxu0 %v2672_v2  ;;  %705 = vmatprep.mubr.bf16.mxu1 %v2672_v2 }
 0x132   : > { %626 = vmatmul.mubr.bf16.gmra.mrb[8].mxu0 %v451_v33  ;;  %706 = vmatmul.mubr.bf16.gmra.mrb[8].mxu1 %v459_v34 }
 0x133   : > { %635 = vmatprep.mubr.bf16.mxu0 %v2672_v2  ;;  %715 = vmatprep.mubr.bf16.mxu1 %v2672_v2 }
 0x13a   : > { %636 = vmatmul.mubr.bf16.gmra.mrb[12].mxu0 %v452_v39  ;;  %716 = vmatmul.mubr.bf16.gmra.mrb[12].mxu1 %v460_v40 }
 0x13b   : > { %645 = vmatprep.mubr.bf16.mxu0 %v2672_v2  ;;  %725 = vmatprep.mubr.bf16.mxu1 %v2672_v2 }
 0x142   : > { %646 = vmatmul.mubr.bf16.gmra.mrb[16].mxu0 %v453_v45  ;;  %726 = vmatmul.mubr.bf16.gmra.mrb[16].mxu1 %v461_v46 }
 0x143   : > { %655 = vmatprep.mubr.bf16.mxu0 %v2672_v2  ;;  %735 = vmatprep.mubr.bf16.mxu1 %v2672_v2 }
 0x14a   : > { %656 = vmatmul.mubr.bf16.gmra.mrb[20].mxu0 %v454_v51  ;;  %736 = vmatmul.mubr.bf16.gmra.mrb[20].mxu1 %v462_v52 }
 0x14b   : > { %665 = vmatprep.mubr.bf16.mxu0 %v2672_v2  ;;  %745 = vmatprep.mubr.bf16.mxu1 %v2672_v2 }
 0x152   : > { %666 = vmatmul.mubr.bf16.gmra.mrb[24].mxu0 %v455_v57  ;;  %746 = vmatmul.mubr.bf16.gmra.mrb[24].mxu1 %v463_v58 }
 0x153   : > { %675 = vmatprep.mubr.bf16.mxu0 %v2672_v2  ;;  %755 = vmatprep.mubr.bf16.mxu1 %v2672_v2 }
 0x15a   : > { %676 = vmatmul.mubr.bf16.gmra.mrb[28].mxu0 %v456_v63  ;;  %756 = vmatmul.mubr.bf16.gmra.mrb[28].mxu1 %v464_v0 }
 0x1f5   : > { %v607_v8 = vpop.f32.mrb[0].mxu0  ;;  %v687_v9 = vpop.f32.mrb[0].mxu1 }
 0x1f6   : > { %v609_v11 = vpop.f32.mrb[1].mxu0  ;;  %v689_v2 = vpop.f32.mrb[1].mxu1  ;;  %v608_v14 = vadd.f32 %v607_v8, %v3125_v7  ;;  %v688_v15 = vadd.f32 %v687_v9, %v3125_v7 }
 0x1f7   : > { %v611_v12 = vpop.f32.mrb[2].mxu0  ;;  %v691_v13 = vpop.f32.mrb[2].mxu1  ;;  %v610_v20 = vadd.f32 %v609_v11, %v3127_v10  ;;  %v690_v21 = vadd.f32 %v689_v2, %v3127_v10 }
 0x1f8   : > { %v612_v16 = vadd.f32 %v611_v12, %v3125_v7  ;;  %v692_v17 = vadd.f32 %v691_v13, %v3125_v7  ;;  %v613_v18 = vpop.f32.mrb[3].mxu0  ;;  %v693_v19 = vpop.f32.mrb[3].mxu1 }
 0x1f9   : > { %v614_v22 = vadd.f32 %v613_v18, %v3127_v10  ;;  %v694_v23 = vadd.f32 %v693_v19, %v3127_v10 }
 0x1fa   : > { %v766_v24 = vpack.c.bf16 %v612_v16, %v608_v14  ;;  %v774_v25 = vpack.c.bf16 %v692_v17, %v688_v15 }
 0x1fb   : > { %v798_v26 = vpack.c.bf16 %v614_v22, %v610_v20  ;;  %v806_v27 = vpack.c.bf16 %v694_v23, %v690_v21 }
 0x1fc   : > { %782 = vst [vmem:[#allocation3] sm:$0xff] %v766_v24  ;;  %790 = vst [vmem:[#allocation3 + $0x40] sm:$0xff] %v774_v25 }
 0x1fd   : > { %815 = vst.msk [vmem:[#allocation2] sm:$0xff] %vm814_vm0, %v798_v26  ;;  %823 = vst.msk [vmem:[#allocation2 + $0x40] sm:$0xff] %vm814_vm0, %v806_v27  ;;  %v617_v28 = vpop.f32.mrb[4].mxu0  ;;  %v697_v29 = vpop.f32.mrb[4].mxu1 }
 0x1fe   : > { %v619_v30 = vpop.f32.mrb[5].mxu0  ;;  %v699_v31 = vpop.f32.mrb[5].mxu1  ;;  %v618_v34 = vadd.f32 %v617_v28, %v3125_v7  ;;  %v698_v35 = vadd.f32 %v697_v29, %v3125_v7 }
 0x1ff   : > { %v621_v32 = vpop.f32.mrb[6].mxu0  ;;  %v701_v33 = vpop.f32.mrb[6].mxu1  ;;  %v620_v40 = vadd.f32 %v619_v30, %v3127_v10  ;;  %v700_v41 = vadd.f32 %v699_v31, %v3127_v10 }
 0x200   : > { %v622_v36 = vadd.f32 %v621_v32, %v3125_v7  ;;  %v702_v37 = vadd.f32 %v701_v33, %v3125_v7  ;;  %v623_v38 = vpop.f32.mrb[7].mxu0  ;;  %v703_v39 = vpop.f32.mrb[7].mxu1 }
 0x201   : > { %v624_v42 = vadd.f32 %v623_v38, %v3127_v10  ;;  %v704_v43 = vadd.f32 %v703_v39, %v3127_v10 }
 0x202   : > { %v767_v44 = vpack.c.bf16 %v622_v36, %v618_v34  ;;  %v775_v45 = vpack.c.bf16 %v702_v37, %v698_v35 }
 0x203   : > { %v799_v46 = vpack.c.bf16 %v624_v42, %v620_v40  ;;  %v807_v47 = vpack.c.bf16 %v704_v43, %v700_v41 }
 0x204   : > { %783 = vst [vmem:[#allocation3 + $0x8] sm:$0xff] %v767_v44  ;;  %791 = vst [vmem:[#allocation3 + $0x48] sm:$0xff] %v775_v45 }
 0x205   : > { %816 = vst.msk [vmem:[#allocation2 + $0x8] sm:$0xff] %vm814_vm0, %v799_v46  ;;  %824 = vst.msk [vmem:[#allocation2 + $0x48] sm:$0xff] %vm814_vm0, %v807_v47  ;;  %v627_v48 = vpop.f32.mrb[8].mxu0  ;;  %v707_v49 = vpop.f32.mrb[8].mxu1 }
 0x206   : > { %v629_v50 = vpop.f32.mrb[9].mxu0  ;;  %v709_v51 = vpop.f32.mrb[9].mxu1  ;;  %v628_v54 = vadd.f32 %v627_v48, %v3125_v7  ;;  %v708_v55 = vadd.f32 %v707_v49, %v3125_v7 }
 0x207   : > { %v631_v52 = vpop.f32.mrb[10].mxu0  ;;  %v711_v53 = vpop.f32.mrb[10].mxu1  ;;  %v630_v60 = vadd.f32 %v629_v50, %v3127_v10  ;;  %v710_v61 = vadd.f32 %v709_v51, %v3127_v10 }
 0x208   : > { %v632_v56 = vadd.f32 %v631_v52, %v3125_v7  ;;  %v712_v57 = vadd.f32 %v711_v53, %v3125_v7  ;;  %v633_v58 = vpop.f32.mrb[11].mxu0  ;;  %v713_v59 = vpop.f32.mrb[11].mxu1 }
 0x209   : > { %v634_v62 = vadd.f32 %v633_v58, %v3127_v10  ;;  %v714_v63 = vadd.f32 %v713_v59, %v3127_v10 }
 0x20a   : > { %v768_v0 = vpack.c.bf16 %v632_v56, %v628_v54  ;;  %v776_v1 = vpack.c.bf16 %v712_v57, %v708_v55 }
 0x20b   : > { %v800_v3 = vpack.c.bf16 %v634_v62, %v630_v60  ;;  %v808_v4 = vpack.c.bf16 %v714_v63, %v710_v61 }
 0x20c   : > { %784 = vst [vmem:[#allocation3 + $0x10] sm:$0xff] %v768_v0  ;;  %792 = vst [vmem:[#allocation3 + $0x50] sm:$0xff] %v776_v1 }
 0x20d   : > { %817 = vst.msk [vmem:[#allocation2 + $0x10] sm:$0xff] %vm814_vm0, %v800_v3  ;;  %825 = vst.msk [vmem:[#allocation2 + $0x50] sm:$0xff] %vm814_vm0, %v808_v4  ;;  %v637_v5 = vpop.f32.mrb[12].mxu0  ;;  %v717_v6 = vpop.f32.mrb[12].mxu1 }
 0x20e   : > { %v639_v8 = vpop.f32.mrb[13].mxu0  ;;  %v719_v9 = vpop.f32.mrb[13].mxu1  ;;  %v638_v12 = vadd.f32 %v637_v5, %v3125_v7  ;;  %v718_v13 = vadd.f32 %v717_v6, %v3125_v7 }
 0x20f   : > { %v641_v11 = vpop.f32.mrb[14].mxu0  ;;  %v721_v2 = vpop.f32.mrb[14].mxu1  ;;  %v640_v18 = vadd.f32 %v639_v8, %v3127_v10  ;;  %v720_v19 = vadd.f32 %v719_v9, %v3127_v10 }
 0x210   : > { %v642_v14 = vadd.f32 %v641_v11, %v3125_v7  ;;  %v722_v15 = vadd.f32 %v721_v2, %v3125_v7  ;;  %v643_v16 = vpop.f32.mrb[15].mxu0  ;;  %v723_v17 = vpop.f32.mrb[15].mxu1 }
 0x211   : > { %v644_v20 = vadd.f32 %v643_v16, %v3127_v10  ;;  %v724_v21 = vadd.f32 %v723_v17, %v3127_v10 }
 0x212   : > { %v769_v22 = vpack.c.bf16 %v642_v14, %v638_v12  ;;  %v777_v23 = vpack.c.bf16 %v722_v15, %v718_v13 }
 0x213   : > { %v801_v24 = vpack.c.bf16 %v644_v20, %v640_v18  ;;  %v809_v25 = vpack.c.bf16 %v724_v21, %v720_v19 }
 0x214   : > { %785 = vst [vmem:[#allocation3 + $0x18] sm:$0xff] %v769_v22  ;;  %793 = vst [vmem:[#allocation3 + $0x58] sm:$0xff] %v777_v23 }
 0x215   : > { %818 = vst.msk [vmem:[#allocation2 + $0x18] sm:$0xff] %vm814_vm0, %v801_v24  ;;  %826 = vst.msk [vmem:[#allocation2 + $0x58] sm:$0xff] %vm814_vm0, %v809_v25  ;;  %v647_v26 = vpop.f32.mrb[16].mxu0  ;;  %v727_v27 = vpop.f32.mrb[16].mxu1 }
 0x216   : > { %v649_v28 = vpop.f32.mrb[17].mxu0  ;;  %v729_v29 = vpop.f32.mrb[17].mxu1  ;;  %v648_v32 = vadd.f32 %v647_v26, %v3125_v7  ;;  %v728_v33 = vadd.f32 %v727_v27, %v3125_v7 }
 0x217   : > { %v651_v30 = vpop.f32.mrb[18].mxu0  ;;  %v731_v31 = vpop.f32.mrb[18].mxu1  ;;  %v650_v38 = vadd.f32 %v649_v28, %v3127_v10  ;;  %v730_v39 = vadd.f32 %v729_v29, %v3127_v10 }
 0x218   : > { %v652_v34 = vadd.f32 %v651_v30, %v3125_v7  ;;  %v732_v35 = vadd.f32 %v731_v31, %v3125_v7  ;;  %v653_v36 = vpop.f32.mrb[19].mxu0  ;;  %v733_v37 = vpop.f32.mrb[19].mxu1 }
 0x219   : > { %v654_v40 = vadd.f32 %v653_v36, %v3127_v10  ;;  %v734_v41 = vadd.f32 %v733_v37, %v3127_v10 }
 0x21a   : > { %v770_v42 = vpack.c.bf16 %v652_v34, %v648_v32  ;;  %v778_v43 = vpack.c.bf16 %v732_v35, %v728_v33 }
 0x21b   : > { %v802_v44 = vpack.c.bf16 %v654_v40, %v650_v38  ;;  %v810_v45 = vpack.c.bf16 %v734_v41, %v730_v39 }
 0x21c   : > { %786 = vst [vmem:[#allocation3 + $0x20] sm:$0xff] %v770_v42  ;;  %794 = vst [vmem:[#allocation3 + $0x60] sm:$0xff] %v778_v43 }
 0x21d   : > { %819 = vst.msk [vmem:[#allocation2 + $0x20] sm:$0xff] %vm814_vm0, %v802_v44  ;;  %827 = vst.msk [vmem:[#allocation2 + $0x60] sm:$0xff] %vm814_vm0, %v810_v45  ;;  %v657_v46 = vpop.f32.mrb[20].mxu0  ;;  %v737_v47 = vpop.f32.mrb[20].mxu1 }
 0x21e   : > { %v659_v48 = vpop.f32.mrb[21].mxu0  ;;  %v739_v49 = vpop.f32.mrb[21].mxu1  ;;  %v658_v52 = vadd.f32 %v657_v46, %v3125_v7  ;;  %v738_v53 = vadd.f32 %v737_v47, %v3125_v7 }
 0x21f   : > { %v661_v50 = vpop.f32.mrb[22].mxu0  ;;  %v741_v51 = vpop.f32.mrb[22].mxu1  ;;  %v660_v58 = vadd.f32 %v659_v48, %v3127_v10  ;;  %v740_v59 = vadd.f32 %v739_v49, %v3127_v10 }
 0x220   : > { %v662_v54 = vadd.f32 %v661_v50, %v3125_v7  ;;  %v742_v55 = vadd.f32 %v741_v51, %v3125_v7  ;;  %v663_v56 = vpop.f32.mrb[23].mxu0  ;;  %v743_v57 = vpop.f32.mrb[23].mxu1 }
 0x221   : > { %v664_v60 = vadd.f32 %v663_v56, %v3127_v10  ;;  %v744_v61 = vadd.f32 %v743_v57, %v3127_v10 }
 0x222   : > { %v771_v62 = vpack.c.bf16 %v662_v54, %v658_v52  ;;  %v779_v63 = vpack.c.bf16 %v742_v55, %v738_v53 }
 0x223   : > { %v803_v0 = vpack.c.bf16 %v664_v60, %v660_v58  ;;  %v811_v1 = vpack.c.bf16 %v744_v61, %v740_v59 }
 0x224   : > { %787 = vst [vmem:[#allocation3 + $0x28] sm:$0xff] %v771_v62  ;;  %795 = vst [vmem:[#allocation3 + $0x68] sm:$0xff] %v779_v63 }
 0x225   : > { %820 = vst.msk [vmem:[#allocation2 + $0x28] sm:$0xff] %vm814_vm0, %v803_v0  ;;  %828 = vst.msk [vmem:[#allocation2 + $0x68] sm:$0xff] %vm814_vm0, %v811_v1  ;;  %v667_v3 = vpop.f32.mrb[24].mxu0  ;;  %v747_v4 = vpop.f32.mrb[24].mxu1 }
 0x226   : > { %v669_v5 = vpop.f32.mrb[25].mxu0  ;;  %v749_v6 = vpop.f32.mrb[25].mxu1  ;;  %v668_v11 = vadd.f32 %v667_v3, %v3125_v7  ;;  %v748_v2 = vadd.f32 %v747_v4, %v3125_v7 }
 0x227   : > { %v671_v8 = vpop.f32.mrb[26].mxu0  ;;  %v751_v9 = vpop.f32.mrb[26].mxu1  ;;  %v670_v16 = vadd.f32 %v669_v5, %v3127_v10  ;;  %v750_v17 = vadd.f32 %v749_v6, %v3127_v10 }
 0x228   : > { %v672_v12 = vadd.f32 %v671_v8, %v3125_v7  ;;  %v752_v13 = vadd.f32 %v751_v9, %v3125_v7  ;;  %v673_v14 = vpop.f32.mrb[27].mxu0  ;;  %v753_v15 = vpop.f32.mrb[27].mxu1 }
 0x229   : > { %v674_v18 = vadd.f32 %v673_v14, %v3127_v10  ;;  %v754_v19 = vadd.f32 %v753_v15, %v3127_v10 }
 0x22a   : > { %v772_v20 = vpack.c.bf16 %v672_v12, %v668_v11  ;;  %v780_v21 = vpack.c.bf16 %v752_v13, %v748_v2 }
 0x22b   : > { %v804_v22 = vpack.c.bf16 %v674_v18, %v670_v16  ;;  %v812_v23 = vpack.c.bf16 %v754_v19, %v750_v17 }
 0x22c   : > { %788 = vst [vmem:[#allocation3 + $0x30] sm:$0xff] %v772_v20  ;;  %796 = vst [vmem:[#allocation3 + $0x70] sm:$0xff] %v780_v21 }
 0x22d   : > { %821 = vst.msk [vmem:[#allocation2 + $0x30] sm:$0xff] %vm814_vm0, %v804_v22  ;;  %829 = vst.msk [vmem:[#allocation2 + $0x70] sm:$0xff] %vm814_vm0, %v812_v23  ;;  %v677_v24 = vpop.f32.mrb[28].mxu0  ;;  %v757_v25 = vpop.f32.mrb[28].mxu1 }
 0x22e   : > { %v679_v26 = vpop.f32.mrb[29].mxu0  ;;  %v759_v27 = vpop.f32.mrb[29].mxu1  ;;  %v678_v30 = vadd.f32 %v677_v24, %v3125_v7  ;;  %v758_v31 = vadd.f32 %v757_v25, %v3125_v7 }
 0x22f   : > { %v681_v28 = vpop.f32.mrb[30].mxu0  ;;  %v761_v29 = vpop.f32.mrb[30].mxu1  ;;  %v680_v36 = vadd.f32 %v679_v26, %v3127_v10  ;;  %v760_v37 = vadd.f32 %v759_v27, %v3127_v10 }
 0x230   : > { %v682_v32 = vadd.f32 %v681_v28, %v3125_v7  ;;  %v762_v33 = vadd.f32 %v761_v29, %v3125_v7  ;;  %v683_v34 = vpop.f32.mrb[31].mxu0  ;;  %v763_v35 = vpop.f32.mrb[31].mxu1 }
 0x231   : > { %v684_v38 = vadd.f32 %v683_v34, %v3127_v10  ;;  %v764_v39 = vadd.f32 %v763_v35, %v3127_v10 }
 0x232   : > { %v773_v40 = vpack.c.bf16 %v682_v32, %v678_v30  ;;  %v781_v41 = vpack.c.bf16 %v762_v33, %v758_v31 }
 0x233   : > { %v805_v42 = vpack.c.bf16 %v684_v38, %v680_v36  ;;  %v813_v43 = vpack.c.bf16 %v764_v39, %v760_v37 }
 0x234   : > { %789 = vst [vmem:[#allocation3 + $0x38] sm:$0xff] %v773_v40  ;;  %797 = vst [vmem:[#allocation3 + $0x78] sm:$0xff] %v781_v41 }
 0x235   : > { %822 = vst.msk [vmem:[#allocation2 + $0x38] sm:$0xff] %vm814_vm0, %v805_v42  ;;  %830 = vst.msk [vmem:[#allocation2 + $0x78] sm:$0xff] %vm814_vm0, %v813_v43 }
 0x236 PF: > { %v2230_v7 = vld [vmem:[#allocation10] sm:$0xff]   ;;  %v2231_v44 = vld [vmem:[#allocation10 + $0x8] sm:$0xff]   ;;  %v2232_v45 = vld [vmem:[#allocation10 + $0x10] sm:$0xff]   ;;  %vm1047_vm1 = vcmask 31744   ;;  %s1602_s13 = sld [smem:[#allocation4]]  ;;  %s3698_s5 = sld [smem:[#allocation23_spill]] }
 0x237   : > { %1995 = vmatprep.subr.bf16.mxu0 %v2230_v7  ;;  %v2233_v10 = vld [vmem:[#allocation10 + $0x18] sm:$0xff]   ;;  %v831_v46 = vld [vmem:[%s3048_s7] sm:$0xff]  ;;  %v832_v47 = vld [vmem:[%s3048_s7 + $0x8] sm:$0xff]  ;;  %s3699_s3 = sld [smem:[#allocation24_spill]]  ;;  %s1668_s0 = sshll.u32 %s3074_s19, 4  ;;  %s3568_s0 = int_to_ptr.vmem [resolvable:$true] %s1668_s0 }
 0x238   : > { %1996 = vmatpush3.bf16.msra.mxu0 %v2230_v7  ;;  %v847_v48 = vpack.c.bf16 %v832_v47, %v831_v46  ;;  %v2234_v49 = vld [vmem:[#allocation10 + $0x20] sm:$0xff]   ;;  %v1040_v53 = vld [vmem:[#allocation2 + $0x48] sm:$0xff]  ;;  %v2236_v56 = vld [vmem:[#allocation10 + $0x30] sm:$0xff]   ;;  %s3700_s25 = sld [smem:[#allocation32_spill]]  ;;  %s1653_s17 = scalar_lea.sflag [#allocation7], %s3044_s9 }
 0x239   : > { %1997 = vmatprep.subr.bf16.mxu0 %v2231_v44  ;;  %v1039_v50 = vld [vmem:[#allocation2 + $0x40] sm:$0xff]  ;;  %v2235_v54 = vld [vmem:[#allocation10 + $0x28] sm:$0xff]   ;;  %v1041_v58 = vld [vmem:[#allocation2 + $0x50] sm:$0xff]  ;;  %s2522_s6 = scalar_lea.vmem %s3568_s0, 2048  ;;  %p3701_p8 = scmp.ne.s32.totalorder %s3675_s16, 0 }
 0x23a   : > { %2011 = vmatprep.mubr.bf16.mxu0 %v847_v48  ;;  %v1031_v51 = vld [vmem:[#allocation2] sm:$0xff]  ;;  %2043 = vmatprep.subr.msk.bf16.mxu1 %vm1047_vm1, %v1039_v50  ;;  %v1032_v55 = vld [vmem:[#allocation2 + $0x8] sm:$0xff]  ;;  %v2237_v59 = vld [vmem:[#allocation10 + $0x38] sm:$0xff]   ;;  %p2523_p6 = scmp.ne.s32.totalorder %s3568_s0, %s2522_s6 }
 0x23b   : > { %v1073_v52 = vsel %vm1047_vm1, %v1031_v51, 0  ;;  %v1076_v57 = vsel %vm1047_vm1, %v1032_v55, 0  ;;  %v1033_v60 = vld [vmem:[#allocation2 + $0x10] sm:$0xff]  ;;  %v834_v62 = vld [vmem:[%s3048_s7 + $0x18] sm:$0xff]  ;;  %v835_v63 = vld [vmem:[%s3048_s7 + $0x20] sm:$0xff] }
 0x23c   : > { %1998 = vmatpush3.bf16.msra.mxu0 %v2231_v44  ;;  %1900 = vmatpush3.bf16.xpose.msra.mxu1 %v1073_v52  ;;  %v833_v61 = vld [vmem:[%s3048_s7 + $0x10] sm:$0xff]  ;;  %v836_v0 = vld [vmem:[%s3048_s7 + $0x28] sm:$0xff]  ;;  %v1079_v1 = vsel %vm1047_vm1, %v1033_v60, 0  ;;  %v1042_v3 = vld [vmem:[#allocation2 + $0x58] sm:$0xff]  ;;  %s1877_s2 = sshll.u32 %s3698_s5, 4  ;;  %p2524_p12 = pnand %p2523_p6, %p3701_p8 }
 0x23d   : > { %1999 = vmatprep.subr.bf16.mxu0 %v2232_v45  ;;  %2044 = vmatprep.subr.msk.bf16.mxu1 %vm1047_vm1, %v1040_v53  ;;  %v848_v4 = vpack.c.bf16 %v834_v62, %v833_v61  ;;  %v849_v5 = vpack.c.bf16 %v836_v0, %v835_v63  ;;  %v1034_v6 = vld [vmem:[#allocation2 + $0x18] sm:$0xff]  ;;  %v837_v8 = vld [vmem:[%s3048_s7 + $0x30] sm:$0xff]  ;;  %v839_v11 = vld [vmem:[%s3048_s7 + $0x40] sm:$0xff]  ;;  %s1878_s22 = sshll.u32 %s3699_s3, 5 }
 0x23e   : > { %v838_v9 = vld [vmem:[%s3048_s7 + $0x38] sm:$0xff]  ;;  %v840_v2 = vld [vmem:[%s3048_s7 + $0x48] sm:$0xff]  ;;  %v1082_v12 = vsel %vm1047_vm1, %v1034_v6, 0  ;;  %v1043_v13 = vld [vmem:[#allocation2 + $0x60] sm:$0xff]  ;;  %s1665_s23 = sadd.s32 %s1878_s22, %s1877_s2  ;;  %p2525_p13 = pneg %p2524_p12 }
 0x23f   : > { %v850_v14 = vpack.c.bf16 %v838_v9, %v837_v8  ;;  %v851_v15 = vpack.c.bf16 %v840_v2, %v839_v11  ;;  %v1035_v16 = vld [vmem:[#allocation2 + $0x20] sm:$0xff]  ;;  %v841_v17 = vld [vmem:[%s3048_s7 + $0x50] sm:$0xff]  ;;  %v842_v18 = vld [vmem:[%s3048_s7 + $0x58] sm:$0xff]  ;;  %s1879_s20 = sshll.u32 %s1665_s23, 7 }
 0x240   : > { %2000 = vmatpush3.bf16.msra.mxu0 %v2232_v45  ;;  %v843_v19 = vld [vmem:[%s3048_s7 + $0x60] sm:$0xff]  ;;  %v844_v20 = vld [vmem:[%s3048_s7 + $0x68] sm:$0xff]  ;;  %v1085_v21 = vsel %vm1047_vm1, %v1035_v16, 0  ;;  %v852_v23 = vpack.c.bf16 %v842_v18, %v841_v17  ;;  %v845_v26 = vld [vmem:[%s3048_s7 + $0x70] sm:$0xff]  ;;  %s3566_s24 = scalar_lea.hbm %s3700_s25, %s1879_s20 }
 0x241   : > { %2001 = vmatprep.subr.bf16.mxu0 %v2233_v10  ;;  %v1044_v22 = vld [vmem:[#allocation2 + $0x68] sm:$0xff]  ;;  %v853_v24 = vpack.c.bf16 %v844_v20, %v843_v19  ;;  %v846_v27 = vld [vmem:[%s3048_s7 + $0x78] sm:$0xff]  ;;  %v1045_v29 = vld [vmem:[#allocation2 + $0x70] sm:$0xff] }
 0x242   : > { %v1036_v25 = vld [vmem:[#allocation2 + $0x28] sm:$0xff]  ;;  %v854_v30 = vpack.c.bf16 %v846_v27, %v845_v26  ;;  %v1037_v31 = vld [vmem:[#allocation2 + $0x30] sm:$0xff]  ;;  %v1046_v33 = vld [vmem:[#allocation2 + $0x78] sm:$0xff] }
 0x243   : > { %v1088_v28 = vsel %vm1047_vm1, %v1036_v25, 0  ;;  %v1091_v32 = vsel %vm1047_vm1, %v1037_v31, 0  ;;  %v1038_v34 = vld [vmem:[#allocation2 + $0x38] sm:$0xff]  ;;  %v1859_v37 = vld [vmem:[#allocation11] ss:$0 sm:$0xff] }
 0x244   : > { %2002 = vmatpush3.bf16.msra.mxu0 %v2233_v10  ;;  %1902 = vmatpush3.bf16.xpose.msra.mxu1 %v1076_v57  ;;  %v1094_v35 = vsel %vm1047_vm1, %v1038_v34, 0 }
 0x245   : > { %2003 = vmatprep.subr.bf16.mxu0 %v2234_v49  ;;  %2045 = vmatprep.subr.msk.bf16.mxu1 %vm1047_vm1, %v1041_v58 }
 0x248   : > { %2004 = vmatpush3.bf16.msra.mxu0 %v2234_v49 }
 0x249   : > { %2005 = vmatprep.subr.bf16.mxu0 %v2235_v54 }
 0x24c   : > { %2006 = vmatpush3.bf16.msra.mxu0 %v2235_v54  ;;  %1904 = vmatpush3.bf16.xpose.msra.mxu1 %v1079_v1 }
 0x24d   : > { %2007 = vmatprep.subr.bf16.mxu0 %v2236_v56  ;;  %2046 = vmatprep.subr.msk.bf16.mxu1 %vm1047_vm1, %v1042_v3 }
 0x250   : > { %2008 = vmatpush3.bf16.msra.mxu0 %v2236_v56 }
 0x251   : > { %2009 = vmatprep.subr.bf16.mxu0 %v2237_v59 }
 0x254   : > { %2010 = vmatpush3.bf16.msra.mxu0 %v2237_v59  ;;  %1906 = vmatpush3.bf16.xpose.msra.mxu1 %v1082_v12 }
 0x255   : > { %2047 = vmatprep.subr.msk.bf16.mxu1 %vm1047_vm1, %v1043_v13 }
 0x257   : > { %2012 = vmatmul.mubr.bf16.vlgmr.msra.gmra.mrb[0].mxu0 %v848_v4 }
 0x258   : > { %2015 = vmatprep.mubr.bf16.mxu0 %v849_v5 }
 0x25c   : > { %1908 = vmatpush3.bf16.xpose.msra.mxu1 %v1085_v21 }
 0x25d   : > { %2048 = vmatprep.subr.msk.bf16.mxu1 %vm1047_vm1, %v1044_v22 }
 0x25f   : > { %2016 = vmatmul.mubr.bf16.gmra.mrb[4].mxu0 %v850_v14 }
 0x260   : > { %2019 = vmatprep.mubr.bf16.mxu0 %v851_v15 }
 0x264   : > { %1910 = vmatpush3.bf16.xpose.msra.mxu1 %v1088_v28 }
 0x265   : > { %2049 = vmatprep.subr.msk.bf16.mxu1 %vm1047_vm1, %v1045_v29 }
 0x267   : > { %2020 = vmatmul.mubr.bf16.gmra.mrb[8].mxu0 %v852_v23 }
 0x268   : > { %2023 = vmatprep.mubr.bf16.mxu0 %v853_v24 }
 0x26c   : > { %1912 = vmatpush3.bf16.xpose.msra.mxu1 %v1091_v32 }
 0x26d   : > { %2050 = vmatprep.subr.msk.bf16.mxu1 %vm1047_vm1, %v1046_v33 }
 0x26f   : > { %2024 = vmatmul.mubr.bf16.gmra.mrb[12].mxu0 %v854_v30 }
 0x274   : > { %1914 = vmatpush3.bf16.xpose.msra.mxu1 %v1094_v35 }
 0x32a   : > { %v2013_v36 = vpop.f32.mrb[0].mxu0 }
 0x32b   : > { %v960_v38 = vpop.f32.mrb[1].mxu0  ;;  %v969_v40 = vadd.f32 %v2013_v36, %v1859_v37 }
 0x32c   : > { %v2014_v39 = vpop.f32.mrb[2].mxu0  ;;  %v961_v43 = vadd.f32 %v1859_v37, %v960_v38 }
 0x32d   : > { %v972_v41 = vadd.f32 %v2014_v39, %v1859_v37  ;;  %v963_v42 = vpop.f32.mrb[3].mxu0 }
 0x32e   : > { %v964_v7 = vadd.f32 %v1859_v37, %v963_v42 }
 0x32f   : > { %v1024_v44 = vpack.c.bf16 %v972_v41, %v969_v40 }
 0x330   : > { %v1023_v45 = vpack.c.bf16 %v964_v7, %v961_v43 }
 0x332   : > { %1915 = vmatprep.mubr.msk.bf16.mxu1 %vm1047_vm1, %v1023_v45  ;;  %v2017_v10 = vpop.f32.mrb[4].mxu0 }
 0x333   : > { %1916 = vmatmul.mubr.msk.bf16.vlgmr.msra.gmra.mrb[0].mxu1 %vm1047_vm1, %v1023_v45  ;;  %v985_v46 = vadd.f32 %v2017_v10, %v1859_v37  ;;  %v976_v47 = vpop.f32.mrb[5].mxu0 }
 0x334   : > { %1917 = vmatprep.mubr.msk.bf16.mxu1 %vm1047_vm1, %v1024_v44  ;;  %v977_v48 = vadd.f32 %v1859_v37, %v976_v47  ;;  %v2018_v49 = vpop.f32.mrb[6].mxu0 }
 0x335   : > { %v988_v50 = vadd.f32 %v2018_v49, %v1859_v37  ;;  %v979_v51 = vpop.f32.mrb[7].mxu0 }
 0x336   : > { %v980_v52 = vadd.f32 %v1859_v37, %v979_v51 }
 0x337   : > { %v1026_v53 = vpack.c.bf16 %v988_v50, %v985_v46 }
 0x338   : > { %v1025_v54 = vpack.c.bf16 %v980_v52, %v977_v48 }
 0x33a   : > { %v2021_v55 = vpop.f32.mrb[8].mxu0 }
 0x33b   : > { %1918 = vmatmul.mubr.msk.bf16.gmra.mrb[4].mxu1 %vm1047_vm1, %v1024_v44  ;;  %v1001_v56 = vadd.f32 %v2021_v55, %v1859_v37  ;;  %v992_v57 = vpop.f32.mrb[9].mxu0 }
 0x33c   : > { %1919 = vmatprep.mubr.msk.bf16.mxu1 %vm1047_vm1, %v1025_v54  ;;  %v993_v58 = vadd.f32 %v1859_v37, %v992_v57  ;;  %v2022_v59 = vpop.f32.mrb[10].mxu0 }
 0x33d   : > { %v1004_v60 = vadd.f32 %v2022_v59, %v1859_v37  ;;  %v995_v61 = vpop.f32.mrb[11].mxu0  ;;  %v1497_v59 = vld [vmem:[#allocation3 + $0x40] sm:$0xff] }
 0x33e   : > { %v996_v62 = vadd.f32 %v1859_v37, %v995_v61  ;;  %v1498_v61 = vld [vmem:[#allocation3 + $0x48] sm:$0xff]  ;;  %1931 = vmatprep.subr.bf16.mxu0 %v1497_v59 }
 0x33f   : > { %v1028_v63 = vpack.c.bf16 %v1004_v60, %v1001_v56  ;;  %v1489_v60 = vld [vmem:[#allocation3] sm:$0xff] }
 0x340   : > { %v1027_v0 = vpack.c.bf16 %v996_v62, %v993_v58  ;;  %1932 = vmatpush3.bf16.msra.mxu0 %v1489_v60  ;;  %v1490_v62 = vld [vmem:[#allocation3 + $0x8] sm:$0xff] }
 0x341   : > { %1933 = vmatprep.subr.bf16.mxu0 %v1498_v61 }
 0x342   : > { %v2025_v1 = vpop.f32.mrb[12].mxu0 }
 0x343   : > { %1920 = vmatmul.mubr.msk.bf16.gmra.mrb[8].mxu1 %vm1047_vm1, %v1025_v54  ;;  %v1017_v3 = vadd.f32 %v2025_v1, %v1859_v37  ;;  %v1008_v4 = vpop.f32.mrb[13].mxu0  ;;  %v1500_v1 = vld [vmem:[#allocation3 + $0x58] sm:$0xff] }
 0x344   : > { %1921 = vmatprep.mubr.msk.bf16.mxu1 %vm1047_vm1, %v1026_v53  ;;  %v1009_v5 = vadd.f32 %v1859_v37, %v1008_v4  ;;  %v2026_v6 = vpop.f32.mrb[14].mxu0  ;;  %1934 = vmatpush3.bf16.msra.mxu0 %v1490_v62 }
 0x345   : > { %v1020_v8 = vadd.f32 %v2026_v6, %v1859_v37  ;;  %v1011_v9 = vpop.f32.mrb[15].mxu0 }
 0x346   : > { %v1012_v11 = vadd.f32 %v1859_v37, %v1011_v9 }
 0x347   : > { %v1030_v2 = vpack.c.bf16 %v1020_v8, %v1017_v3 }
 0x348   : > { %v1029_v12 = vpack.c.bf16 %v1012_v11, %v1009_v5 }
 0x34b   : > { %1922 = vmatmul.mubr.msk.bf16.gmra.mrb[12].mxu1 %vm1047_vm1, %v1026_v53 }
 0x34c   : > { %1923 = vmatprep.mubr.msk.bf16.mxu1 %vm1047_vm1, %v1027_v0 }
 0x353   : > { %1924 = vmatmul.mubr.msk.bf16.gmra.mrb[16].mxu1 %vm1047_vm1, %v1027_v0  ;;  %v1491_v0 = vld [vmem:[#allocation3 + $0x10] sm:$0xff] }
 0x354   : > { %1925 = vmatprep.mubr.msk.bf16.mxu1 %vm1047_vm1, %v1028_v63 }
 0x35b   : > { %1926 = vmatmul.mubr.msk.bf16.gmra.mrb[20].mxu1 %vm1047_vm1, %v1028_v63  ;;  %v1499_v63 = vld [vmem:[#allocation3 + $0x50] sm:$0xff] }
 0x35c   : > { %1927 = vmatprep.mubr.msk.bf16.mxu1 %vm1047_vm1, %v1029_v12  ;;  %1935 = vmatprep.subr.bf16.mxu0 %v1499_v63 }
 0x35d   : > { %1936 = vmatpush3.bf16.msra.mxu0 %v1491_v0 }
 0x35e   : > { %1937 = vmatprep.subr.bf16.mxu0 %v1500_v1 }
 0x363   : > { %1928 = vmatmul.mubr.msk.bf16.gmra.mrb[24].mxu1 %vm1047_vm1, %v1029_v12 }
 0x364   : > { %1929 = vmatprep.mubr.msk.bf16.mxu1 %vm1047_vm1, %v1030_v2 }
 0x36b   : > { %1930 = vmatmul.mubr.msk.bf16.gmra.mrb[28].mxu1 %vm1047_vm1, %v1030_v2 }
 0x406   : > { %v3257_v13 = vpop.f32.mrb[0].mxu1 }
 0x407   : > { %v3259_v14 = vpop.f32.mrb[1].mxu1 }
 0x408   : > { %v3261_v15 = vpop.f32.mrb[2].mxu1  ;;  %v1233_v16 = vmax.f32 %v3257_v13, %v3259_v14 }
 0x409   : > { %v3265_v17 = vpop.f32.mrb[3].mxu1 }
 0x40a   : > { %1234 = vmax.xlane.f32.xlu0 %v1233_v16  ;;  %v1236_v18 = vmax.f32 %v3261_v15, %v3265_v17 }
 0x40e   : > { %1237 = vmax.xlane.f32.xlu0 %v1236_v18  ;;  %v3269_v19 = vpop.f32.mrb[4].mxu1 }
 0x40f   : > { %v3271_v20 = vpop.f32.mrb[5].mxu1 }
 0x410   : > { %v3273_v21 = vpop.f32.mrb[6].mxu1  ;;  %v1239_v22 = vmax.f32 %v3269_v19, %v3271_v20 }
 0x411   : > { %v3277_v23 = vpop.f32.mrb[7].mxu1 }
 0x412   : > { %1240 = vmax.xlane.f32.xlu1 %v1239_v22  ;;  %v1242_v24 = vmax.f32 %v3273_v21, %v3277_v23 }
 0x416   : > { %1243 = vmax.xlane.f32.xlu1 %v1242_v24  ;;  %v3281_v25 = vpop.f32.mrb[8].mxu1 }
 0x417   : > { %v3283_v26 = vpop.f32.mrb[9].mxu1 }
 0x418   : > { %v3285_v27 = vpop.f32.mrb[10].mxu1  ;;  %v1245_v28 = vmax.f32 %v3281_v25, %v3283_v26 }
 0x419   : > { %v3289_v29 = vpop.f32.mrb[11].mxu1 }
 0x41a   : > { %1246 = vmax.xlane.f32.xlu0 %v1245_v28  ;;  %v1248_v30 = vmax.f32 %v3285_v27, %v3289_v29 }
 0x41c   : > { %1249 = vmax.xlane.f32.xlu1 %v1248_v30 }
 0x41e   : > { %v3293_v31 = vpop.f32.mrb[12].mxu1 }
 0x41f   : > { %v3295_v32 = vpop.f32.mrb[13].mxu1 }
 0x420   : > { %v3297_v33 = vpop.f32.mrb[14].mxu1  ;;  %v1251_v34 = vmax.f32 %v3293_v31, %v3295_v32 }
 0x421   : > { %v3301_v35 = vpop.f32.mrb[15].mxu1 }
 0x422   : > { %1252 = vmax.xlane.f32.xlu0 %v1251_v34  ;;  %v1254_v36 = vmax.f32 %v3297_v33, %v3301_v35 }
 0x424   : > { %1255 = vmax.xlane.f32.xlu1 %v1254_v36 }
 0x426   : > { %v3305_v37 = vpop.f32.mrb[16].mxu1 }
 0x427   : > { %v3307_v38 = vpop.f32.mrb[17].mxu1 }
 0x428   : > { %v3309_v39 = vpop.f32.mrb[18].mxu1  ;;  %v1257_v40 = vmax.f32 %v3305_v37, %v3307_v38 }
 0x429   : > { %v3313_v41 = vpop.f32.mrb[19].mxu1 }
 0x42a   : > { %1258 = vmax.xlane.f32.xlu0 %v1257_v40  ;;  %v1260_v42 = vmax.f32 %v3309_v39, %v3313_v41 }
 0x42c   : > { %1261 = vmax.xlane.f32.xlu1 %v1260_v42 }
 0x42e   : > { %v3317_v43 = vpop.f32.mrb[20].mxu1 }
 0x42f   : > { %v3319_v7 = vpop.f32.mrb[21].mxu1 }
 0x430   : > { %v3321_v44 = vpop.f32.mrb[22].mxu1  ;;  %v1263_v45 = vmax.f32 %v3317_v43, %v3319_v7 }
 0x431   : > { %v3325_v10 = vpop.f32.mrb[23].mxu1 }
 0x432   : > { %1264 = vmax.xlane.f32.xlu0 %v1263_v45  ;;  %v1266_v46 = vmax.f32 %v3321_v44, %v3325_v10 }
 0x434   : > { %1267 = vmax.xlane.f32.xlu1 %v1266_v46 }
 0x436   : > { %v3329_v47 = vpop.f32.mrb[24].mxu1 }
 0x437   : > { %v3331_v48 = vpop.f32.mrb[25].mxu1 }
 0x438   : > { %v3333_v49 = vpop.f32.mrb[26].mxu1  ;;  %v1269_v50 = vmax.f32 %v3329_v47, %v3331_v48 }
 0x439   : > { %v3337_v51 = vpop.f32.mrb[27].mxu1 }
 0x43a   : > { %1270 = vmax.xlane.f32.xlu0 %v1269_v50  ;;  %v1272_v52 = vmax.f32 %v3333_v49, %v3337_v51 }
 0x43c   : > { %1273 = vmax.xlane.f32.xlu1 %v1272_v52 }
 0x43e   : > { %v3341_v53 = vpop.f32.mrb[28].mxu1 }
 0x43f   : > { %v3343_v54 = vpop.f32.mrb[29].mxu1 }
 0x440   : > { %v3345_v55 = vpop.f32.mrb[30].mxu1  ;;  %v1275_v56 = vmax.f32 %v3341_v53, %v3343_v54 }
 0x441   : > { %v3349_v57 = vpop.f32.mrb[31].mxu1 }
 0x442   : > { %v1278_v58 = vmax.f32 %v3345_v55, %v3349_v57  ;;  %1276 = vmax.xlane.f32.xlu0 %v1275_v56 }
 0x444   : > { %1279 = vmax.xlane.f32.xlu1 %v1278_v58 }
 0x497   : > { %v1235_v3 = vpop.xlane.xlu0 %1234 }
 0x498   : > { %v1281_v4 = vsub.f32 %v3257_v13, %v1235_v3  ;;  %v1282_v5 = vsub.f32 %v3259_v14, %v1235_v3 }
 0x49a   : > { %v1313_v6 = vmul.f32 1.442695, %v1281_v4  ;;  %v1315_v8 = vmul.f32 1.442695, %v1282_v5 }
 0x49b   : > { %v1238_v9 = vpop.xlane.xlu0 %1237 }
 0x49c   : > { %2238 = vpow2.f32 %v1313_v6  ;;  %v1283_v11 = vsub.f32 %v3261_v15, %v1238_v9  ;;  %v1284_v2 = vsub.f32 %v3265_v17, %v1238_v9 }
 0x49d   : > { %2240 = vpow2.f32 %v1315_v8 }
 0x49e   : > { %v1317_v12 = vmul.f32 1.442695, %v1283_v11  ;;  %v1319_v16 = vmul.f32 1.442695, %v1284_v2 }
 0x49f   : > { %v1241_v18 = vpop.xlane.xlu1 %1240 }
 0x4a0   : > { %2242 = vpow2.f32 %v1317_v12  ;;  %v1285_v22 = vsub.f32 %v3269_v19, %v1241_v18  ;;  %v1286_v24 = vsub.f32 %v3271_v20, %v1241_v18 }
 0x4a1   : > { %2244 = vpow2.f32 %v1319_v16 }
 0x4a2   : > { %v1321_v13 = vmul.f32 1.442695, %v1285_v22  ;;  %v1323_v14 = vmul.f32 1.442695, %v1286_v24 }
 0x4a3   : > { %v1244_v28 = vpop.xlane.xlu1 %1243 }
 0x4a4   : > { %2246 = vpow2.f32 %v1321_v13  ;;  %v1287_v30 = vsub.f32 %v3273_v21, %v1244_v28  ;;  %v1288_v15 = vsub.f32 %v3277_v23, %v1244_v28  ;;  %v1492_v13 = vld [vmem:[#allocation3 + $0x18] sm:$0xff] }
 0x4a5   : > { %2248 = vpow2.f32 %v1323_v14  ;;  %1938 = vmatpush3.bf16.msra.mxu0 %v1492_v13 }
 0x4a6   : > { %v3361_v17 = vpop.eup %2238  ;;  %v1325_v34 = vmul.f32 1.442695, %v1287_v30  ;;  %v1327_v36 = vmul.f32 1.442695, %v1288_v15 }
 0x4a7   : > { %v3363_v40 = vpop.eup %2240  ;;  %v1247_v42 = vpop.xlane.xlu0 %1246 }
 0x4a8   : > { %2250 = vpow2.f32 %v1325_v34  ;;  %v1289_v19 = vsub.f32 %v3281_v25, %v1247_v42  ;;  %v1290_v20 = vsub.f32 %v3283_v26, %v1247_v42  ;;  %v1377_v45 = vadd.f32 %v3363_v40, %v3361_v17  ;;  %v1493_v42 = vld [vmem:[#allocation3 + $0x20] sm:$0xff] }
 0x4a9   : > { %2252 = vpow2.f32 %v1327_v36  ;;  %v1250_v21 = vpop.xlane.xlu1 %1249  ;;  %v1501_v36 = vld [vmem:[#allocation3 + $0x60] sm:$0xff] }
 0x4aa   : > { %v3369_v46 = vpop.eup %2242  ;;  %v1329_v23 = vmul.f32 1.442695, %v1289_v19  ;;  %v1331_v50 = vmul.f32 1.442695, %v1290_v20  ;;  %v1291_v52 = vsub.f32 %v3285_v27, %v1250_v21  ;;  %v1292_v56 = vsub.f32 %v3289_v29, %v1250_v21  ;;  %1378 = vadd.xlane.f32.xlu0 %v1377_v45  ;;  %1939 = vmatprep.subr.bf16.mxu0 %v1501_v36 }
 0x4ab   : > { %v3373_v58 = vpop.eup %2244  ;;  %1940 = vmatpush3.bf16.msra.mxu0 %v1493_v42 }
 0x4ac   : > { %2254 = vpow2.f32 %v1329_v23  ;;  %v1333_v25 = vmul.f32 1.442695, %v1291_v52  ;;  %v1335_v59 = vmul.f32 1.442695, %v1292_v56  ;;  %v1380_v26 = vadd.f32 %v3373_v58, %v3369_v46 }
 0x4ad   : > { %2256 = vpow2.f32 %v1331_v50  ;;  %v1502_v50 = vld [vmem:[#allocation3 + $0x68] sm:$0xff] }
 0x4ae   : > { %v3377_v60 = vpop.eup %2246  ;;  %2258 = vpow2.f32 %v1333_v25  ;;  %1381 = vadd.xlane.f32.xlu1 %v1380_v26  ;;  %1941 = vmatprep.subr.bf16.mxu0 %v1502_v50  ;;  %v1494_v25 = vld [vmem:[#allocation3 + $0x28] sm:$0xff] }
 0x4af   : > { %v3379_v61 = vpop.eup %2248  ;;  %2260 = vpow2.f32 %v1335_v59  ;;  %v1253_v27 = vpop.xlane.xlu0 %1252  ;;  %1942 = vmatpush3.bf16.msra.mxu0 %v1494_v25 }
 0x4b0   : > { %v1293_v29 = vsub.f32 %v3293_v31, %v1253_v27  ;;  %v1294_v62 = vsub.f32 %v3295_v32, %v1253_v27  ;;  %v1383_v63 = vadd.f32 %v3379_v61, %v3377_v60 }
 0x4b1   : > { %v1256_v0 = vpop.xlane.xlu1 %1255 }
 0x4b2   : > { %v3385_v1 = vpop.eup %2250  ;;  %v1337_v3 = vmul.f32 1.442695, %v1293_v29  ;;  %v1339_v4 = vmul.f32 1.442695, %v1294_v62  ;;  %v1295_v5 = vsub.f32 %v3297_v33, %v1256_v0  ;;  %v1296_v6 = vsub.f32 %v3301_v35, %v1256_v0  ;;  %1384 = vadd.xlane.f32.xlu0 %v1383_v63  ;;  %v1503_v63 = vld [vmem:[#allocation3 + $0x70] sm:$0xff] }
 0x4b3   : > { %v3389_v8 = vpop.eup %2252  ;;  %1943 = vmatprep.subr.bf16.mxu0 %v1503_v63  ;;  %v1495_v0 = vld [vmem:[#allocation3 + $0x30] sm:$0xff] }
 0x4b4   : > { %2262 = vpow2.f32 %v1337_v3  ;;  %v1341_v9 = vmul.f32 1.442695, %v1295_v5  ;;  %v1343_v31 = vmul.f32 1.442695, %v1296_v6  ;;  %v1386_v32 = vadd.f32 %v3389_v8, %v3385_v1  ;;  %1944 = vmatpush3.bf16.msra.mxu0 %v1495_v0 }
 0x4b5   : > { %2264 = vpow2.f32 %v1339_v4  ;;  %v1504_v4 = vld [vmem:[#allocation3 + $0x78] sm:$0xff] }
 0x4b6   : > { %v3393_v11 = vpop.eup %2254  ;;  %2266 = vpow2.f32 %v1341_v9  ;;  %1387 = vadd.xlane.f32.xlu1 %v1386_v32  ;;  %1945 = vmatprep.subr.bf16.mxu0 %v1504_v4  ;;  %v1496_v32 = vld [vmem:[#allocation3 + $0x38] sm:$0xff] }
 0x4b7   : > { %v3395_v2 = vpop.eup %2256  ;;  %2268 = vpow2.f32 %v1343_v31  ;;  %v1259_v33 = vpop.xlane.xlu0 %1258 }
 0x4b8   : > { %v3397_v12 = vpop.eup %2258  ;;  %v1297_v35 = vsub.f32 %v3305_v37, %v1259_v33  ;;  %v1298_v16 = vsub.f32 %v3307_v38, %v1259_v33  ;;  %v1389_v18 = vadd.f32 %v3395_v2, %v3393_v11  ;;  %1946 = vmatpush3.bf16.msra.mxu0 %v1496_v32 }
 0x4b9   : > { %v3403_v22 = vpop.eup %2260  ;;  %v1262_v24 = vpop.xlane.xlu1 %1261 }
 0x4ba   : > { %v1345_v14 = vmul.f32 1.442695, %v1297_v35  ;;  %v1347_v28 = vmul.f32 1.442695, %v1298_v16  ;;  %v1299_v30 = vsub.f32 %v3309_v39, %v1262_v24  ;;  %v1300_v15 = vsub.f32 %v3313_v41, %v1262_v24  ;;  %1390 = vadd.xlane.f32.xlu0 %v1389_v18 }
 0x4bb   : > { %v1392_v37 = vadd.f32 %v3403_v22, %v3397_v12 }
 0x4bc   : > { %2270 = vpow2.f32 %v1345_v14  ;;  %v1349_v38 = vmul.f32 1.442695, %v1299_v30  ;;  %v1351_v34 = vmul.f32 1.442695, %v1300_v15 }
 0x4bd   : > { %2272 = vpow2.f32 %v1347_v28  ;;  %1393 = vadd.xlane.f32.xlu1 %v1392_v37 }
 0x4be   : > { %v3409_v19 = vpop.eup %2262  ;;  %2274 = vpow2.f32 %v1349_v38 }
 0x4bf   : > { %v3411_v39 = vpop.eup %2264  ;;  %2276 = vpow2.f32 %v1351_v34  ;;  %v1265_v41 = vpop.xlane.xlu0 %1264 }
 0x4c0   : > { %v3413_v20 = vpop.eup %2266  ;;  %v1301_v45 = vsub.f32 %v3317_v43, %v1265_v41  ;;  %v1302_v21 = vsub.f32 %v3319_v7, %v1265_v41  ;;  %v1395_v23 = vadd.f32 %v3411_v39, %v3409_v19 }
 0x4c1   : > { %v3419_v52 = vpop.eup %2268  ;;  %v1268_v56 = vpop.xlane.xlu1 %1267 }
 0x4c2   : > { %v1353_v59 = vmul.f32 1.442695, %v1301_v45  ;;  %v1355_v26 = vmul.f32 1.442695, %v1302_v21  ;;  %v1303_v27 = vsub.f32 %v3321_v44, %v1268_v56  ;;  %v1304_v29 = vsub.f32 %v3325_v10, %v1268_v56  ;;  %1396 = vadd.xlane.f32.xlu0 %v1395_v23 }
 0x4c3   : > { %v1398_v43 = vadd.f32 %v3419_v52, %v3413_v20 }
 0x4c4   : > { %2278 = vpow2.f32 %v1353_v59  ;;  %v1357_v7 = vmul.f32 1.442695, %v1303_v27  ;;  %v1359_v62 = vmul.f32 1.442695, %v1304_v29 }
 0x4c5   : > { %2280 = vpow2.f32 %v1355_v26  ;;  %1399 = vadd.xlane.f32.xlu1 %v1398_v43 }
 0x4c6   : > { %v3425_v3 = vpop.eup %2270  ;;  %2282 = vpow2.f32 %v1357_v7 }
 0x4c7   : > { %v3427_v44 = vpop.eup %2272  ;;  %2284 = vpow2.f32 %v1359_v62  ;;  %v1271_v10 = vpop.xlane.xlu0 %1270 }
 0x4c8   : > { %v3429_v5 = vpop.eup %2274  ;;  %v1305_v6 = vsub.f32 %v3329_v47, %v1271_v10  ;;  %v1306_v9 = vsub.f32 %v3331_v48, %v1271_v10  ;;  %v1401_v31 = vadd.f32 %v3427_v44, %v3425_v3 }
 0x4c9   : > { %v3435_v33 = vpop.eup %2276  ;;  %v1274_v35 = vpop.xlane.xlu1 %1273 }
 0x4ca   : > { %v1361_v16 = vmul.f32 1.442695, %v1305_v6  ;;  %v1363_v18 = vmul.f32 1.442695, %v1306_v9  ;;  %v1307_v24 = vsub.f32 %v3333_v49, %v1274_v35  ;;  %v1308_v13 = vsub.f32 %v3337_v51, %v1274_v35  ;;  %1402 = vadd.xlane.f32.xlu0 %v1401_v31 }
 0x4cb   : > { %v1404_v47 = vadd.f32 %v3435_v33, %v3429_v5 }
 0x4cc   : > { %2286 = vpow2.f32 %v1361_v16  ;;  %v1365_v48 = vmul.f32 1.442695, %v1307_v24  ;;  %v1367_v14 = vmul.f32 1.442695, %v1308_v13 }
 0x4cd   : > { %2288 = vpow2.f32 %v1363_v18  ;;  %1405 = vadd.xlane.f32.xlu1 %v1404_v47 }
 0x4ce   : > { %v3441_v28 = vpop.eup %2278  ;;  %2290 = vpow2.f32 %v1365_v48 }
 0x4cf   : > { %v3443_v30 = vpop.eup %2280  ;;  %2292 = vpow2.f32 %v1367_v14  ;;  %v1277_v15 = vpop.xlane.xlu0 %1276 }
 0x4d0   : > { %v3445_v49 = vpop.eup %2282  ;;  %v1309_v51 = vsub.f32 %v3341_v53, %v1277_v15  ;;  %v1310_v37 = vsub.f32 %v3343_v54, %v1277_v15  ;;  %v1407_v38 = vadd.f32 %v3443_v30, %v3441_v28 }
 0x4d1   : > { %v3451_v34 = vpop.eup %2284  ;;  %v1280_v36 = vpop.xlane.xlu1 %1279 }
 0x4d2   : > { %v1369_v42 = vmul.f32 1.442695, %v1309_v51  ;;  %v1371_v41 = vmul.f32 1.442695, %v1310_v37  ;;  %1408 = vadd.xlane.f32.xlu0 %v1407_v38  ;;  %v1311_v45 = vsub.f32 %v3345_v55, %v1280_v36  ;;  %v1312_v21 = vsub.f32 %v3349_v57, %v1280_v36 }
 0x4d3   : > { %v1410_v23 = vadd.f32 %v3451_v34, %v3445_v49 }
 0x4d4   : > { %2294 = vpow2.f32 %v1369_v42  ;;  %v1373_v53 = vmul.f32 1.442695, %v1311_v45  ;;  %v1375_v50 = vmul.f32 1.442695, %v1312_v21 }
 0x4d5   : > { %2296 = vpow2.f32 %v1371_v41  ;;  %1411 = vadd.xlane.f32.xlu1 %v1410_v23 }
 0x4d6   : > { %v3457_v54 = vpop.eup %2286  ;;  %2298 = vpow2.f32 %v1373_v53 }
 0x4d7   : > { %v3459_v56 = vpop.eup %2288  ;;  %2300 = vpow2.f32 %v1375_v50 }
 0x4d8   : > { %v3461_v25 = vpop.eup %2290  ;;  %v1413_v55 = vadd.f32 %v3459_v56, %v3457_v54 }
 0x4d9   : > { %v3465_v57 = vpop.eup %2292 }
 0x4da   : > { %1414 = vadd.xlane.f32.xlu0 %v1413_v55  ;;  %v1416_v59 = vadd.f32 %v3465_v57, %v3461_v25 }
 0x4dc   : > { %1417 = vadd.xlane.f32.xlu1 %v1416_v59 }
 0x4de   : > { %v3469_v26 = vpop.eup %2294 }
 0x4df   : > { %v3471_v27 = vpop.eup %2296 }
 0x4e0   : > { %v3473_v29 = vpop.eup %2298  ;;  %v1419_v43 = vadd.f32 %v3471_v27, %v3469_v26 }
 0x4e1   : > { %v3477_v7 = vpop.eup %2300 }
 0x4e2   : > { %1420 = vadd.xlane.f32.xlu0 %v1419_v43  ;;  %v1422_v62 = vadd.f32 %v3477_v7, %v3473_v29 }
 0x4e4   : > { %1423 = vadd.xlane.f32.xlu1 %v1422_v62 }
 0x537   : > { %v1379_v63 = vpop.xlane.xlu0 %1378 }
 0x538   : > { %2302 = vrcp.f32 %v1379_v63 }
 0x53b   : > { %v1382_v0 = vpop.xlane.xlu1 %1381 }
 0x53c   : > { %2304 = vrcp.f32 %v1382_v0 }
 0x53f   : > { %v1385_v10 = vpop.xlane.xlu0 %1384 }
 0x540   : > { %2306 = vrcp.f32 %v1385_v10 }
 0x542   : > { %v2303_v6 = vpop.eup %2302 }
 0x543   : > { %v1388_v4 = vpop.xlane.xlu1 %1387  ;;  %v1441_v31 = vmul.f32 %v2303_v6, %v3361_v17  ;;  %v1442_v16 = vmul.f32 %v2303_v6, %v3363_v40 }
 0x544   : > { %2308 = vrcp.f32 %v1388_v4 }
 0x546   : > { %v2305_v9 = vpop.eup %2304 }
 0x547   : > { %v1443_v32 = vmul.f32 %v2305_v9, %v3369_v46  ;;  %v1391_v35 = vpop.xlane.xlu0 %1390  ;;  %v1444_v18 = vmul.f32 %v2305_v9, %v3373_v58 }
 0x548   : > { %2310 = vrcp.f32 %v1391_v35 }
 0x549   : > { %v1474_v24 = vpack.c.bf16 %v1444_v18, %v1442_v16  ;;  %v1473_v13 = vpack.c.bf16 %v1443_v32, %v1441_v31 }
 0x54a   : > { %v1394_v47 = vpop.xlane.xlu1 %1393  ;;  %v2307_v48 = vpop.eup %2306 }
 0x54b   : > { %2312 = vrcp.f32 %v1394_v47  ;;  %1537 = vmatprep.mubr.bf16.mxu0 %v1474_v24  ;;  %v1446_v51 = vmul.f32 %v2307_v48, %v3379_v61  ;;  %v1445_v46 = vmul.f32 %v2307_v48, %v3377_v60 }
 0x54c   : > { %1538 = vmatmul.mubr.bf16.vlgmr.msra.gmra.mrb[16].mxu0 %v1473_v13 }
 0x54e   : > { %v2309_v14 = vpop.eup %2308 }
 0x54f   : > { %v1397_v15 = vpop.xlane.xlu0 %1396  ;;  %v1448_v17 = vmul.f32 %v2309_v14, %v3389_v8  ;;  %v1447_v40 = vmul.f32 %v2309_v14, %v3385_v1 }
 0x550   : > { %2314 = vrcp.f32 %v1397_v15 }
 0x551   : > { %v1476_v58 = vpack.c.bf16 %v1448_v17, %v1446_v51  ;;  %v1475_v37 = vpack.c.bf16 %v1447_v40, %v1445_v46 }
 0x552   : > { %v1400_v38 = vpop.xlane.xlu1 %1399  ;;  %v2311_v36 = vpop.eup %2310 }
 0x553   : > { %2316 = vrcp.f32 %v1400_v38  ;;  %1545 = vmatprep.mubr.bf16.mxu0 %v1476_v58  ;;  %v1450_v41 = vmul.f32 %v2311_v36, %v3395_v2  ;;  %v1449_v60 = vmul.f32 %v2311_v36, %v3393_v11 }
 0x554   : > { %1546 = vmatmul.mubr.bf16.gmra.mrb[20].mxu0 %v1475_v37  ;;  %v3513_v37 = vstv %s1602_s13  ;;  %s2673_s13 = smov [#allocation16]  }
 0x555   : > { %v2313_v42 = vpop.eup %2312  ;;  %s2526_s5 = sshll.u32 %s2673_s13, 4  ;;  %s2527_s5 = int_to_ptr.vmem [resolvable:$false] %s2526_s5 }
 0x556   : > { %v1452_v45 = vmul.f32 %v2313_v42, %v3403_v22  ;;  %v1451_v61 = vmul.f32 %v2313_v42, %v3397_v12  ;;  %v2334_v42 = vld [vmem:[%s3048_s7] sm:$0xff]  ;;  %s2528_s3 = scalar_lea.vmem %s2527_s5, 4096  ;;  %p2529_p4 = scmp.lt.s32.totalorder %s3568_s0, %s2527_s5 }
 0x557   : > { %v1403_v8 = vpop.xlane.xlu0 %1402  ;;  %p2530_p10 = scmp.lt.s32.totalorder %s2528_s3, %s2522_s6 }
 0x558   : > { %v1478_v21 = vpack.c.bf16 %v1452_v45, %v1450_v41  ;;  %2318 = vrcp.f32 %v1403_v8  ;;  %v1477_v23 = vpack.c.bf16 %v1451_v61, %v1449_v60  ;;  %v2335_v45 = vld [vmem:[%s3048_s7 + $0x8] sm:$0xff] }
 0x559   : > { %p2531_p2 = por %p2530_p10, %p2529_p4 }
 0x55a   : > { %1553 = vmatprep.mubr.bf16.mxu0 %v1478_v21  ;;  %v1406_v1 = vpop.xlane.xlu1 %1405  ;;  %v2315_v53 = vpop.eup %2314 }
 0x55b   : > { %2320 = vrcp.f32 %v1406_v1  ;;  %v1454_v55 = vmul.f32 %v2315_v53, %v3411_v39  ;;  %v1453_v43 = vmul.f32 %v2315_v53, %v3409_v19  ;;  %p2532_p5 = pnand %p2531_p2, %p2525_p13 }
 0x55c   : > { %1554 = vmatmul.mubr.bf16.gmra.mrb[24].mxu0 %v1477_v23 }
 0x55d   : > { %v2317_v50 = vpop.eup %2316 }
 0x55e   : > { %v1456_v2 = vmul.f32 %v2317_v50, %v3419_v52  ;;  %v1455_v22 = vmul.f32 %v2317_v50, %v3413_v20 }
 0x55f   : > { %v1409_v59 = vpop.xlane.xlu0 %1408 }
 0x560   : > { %v1480_v12 = vpack.c.bf16 %v1456_v2, %v1454_v55  ;;  %2322 = vrcp.f32 %v1409_v59  ;;  %v1479_v62 = vpack.c.bf16 %v1455_v22, %v1453_v43  ;;  %v2336_v55 = vld [vmem:[%s3048_s7 + $0x10] sm:$0xff]  ;;  %v2337_v59 = vld [vmem:[%s3048_s7 + $0x18] sm:$0xff] }
 0x562   : > { %1561 = vmatprep.mubr.bf16.mxu0 %v1480_v12  ;;  %v1412_v11 = vpop.xlane.xlu1 %1411  ;;  %v2319_v63 = vpop.eup %2318 }
 0x563   : > { %2324 = vrcp.f32 %v1412_v11  ;;  %v1458_v10 = vmul.f32 %v2319_v63, %v3427_v44  ;;  %v1457_v6 = vmul.f32 %v2319_v63, %v3425_v3 }
 0x564   : > { %1562 = vmatmul.mubr.bf16.gmra.mrb[28].mxu0 %v1479_v62 }
 0x565   : > { %v2321_v0 = vpop.eup %2320 }
 0x566   : > { %v1460_v39 = vmul.f32 %v2321_v0, %v3435_v33  ;;  %v1459_v52 = vmul.f32 %v2321_v0, %v3429_v5 }
 0x567   : > { %v1415_v4 = vpop.xlane.xlu0 %1414 }
 0x568   : > { %2326 = vrcp.f32 %v1415_v4  ;;  %v1482_v20 = vpack.c.bf16 %v1460_v39, %v1458_v10  ;;  %v1481_v9 = vpack.c.bf16 %v1459_v52, %v1457_v6  ;;  %v2338_v52 = vld [vmem:[%s3048_s7 + $0x20] sm:$0xff]  ;;  %v2339_v6 = vld [vmem:[%s3048_s7 + $0x28] sm:$0xff] }
 0x569   : > { %v1418_v19 = vpop.xlane.xlu1 %1417 }
 0x56a   : > { %1569 = vmatprep.mubr.bf16.mxu0 %v1482_v20  ;;  %2328 = vrcp.f32 %v1418_v19  ;;  %v2323_v31 = vpop.eup %2322 }
 0x56b   : > { %v1462_v35 = vmul.f32 %v2323_v31, %v3443_v30  ;;  %v1461_v18 = vmul.f32 %v2323_v31, %v3441_v28 }
 0x56c   : > { %1570 = vmatmul.mubr.bf16.gmra.mrb[32].mxu0 %v1481_v9 }
 0x56d   : > { %v2325_v32 = vpop.eup %2324 }
 0x56e   : > { %v1464_v44 = vmul.f32 %v2325_v32, %v3451_v34  ;;  %v1463_v33 = vmul.f32 %v2325_v32, %v3445_v49 }
 0x56f   : > { %v1421_v16 = vpop.xlane.xlu0 %1420 }
 0x570   : > { %2330 = vrcp.f32 %v1421_v16  ;;  %v1484_v5 = vpack.c.bf16 %v1464_v44, %v1462_v35  ;;  %v1483_v13 = vpack.c.bf16 %v1463_v33, %v1461_v18 }
 0x571   : > { %v1424_v24 = vpop.xlane.xlu1 %1423 }
 0x572   : > { %v2327_v3 = vpop.eup %2326  ;;  %1577 = vmatprep.mubr.bf16.mxu0 %v1484_v5  ;;  %2332 = vrcp.f32 %v1424_v24  ;;  %v2340_v5 = vld [vmem:[%s3048_s7 + $0x30] sm:$0xff] }
 0x573   : > { %v1466_v48 = vmul.f32 %v2327_v3, %v3459_v56  ;;  %v1465_v49 = vmul.f32 %v2327_v3, %v3457_v54  ;;  %v2341_v3 = vld [vmem:[%s3048_s7 + $0x38] sm:$0xff] }
 0x574   : > { %v2329_v47 = vpop.eup %2328  ;;  %1578 = vmatmul.mubr.bf16.gmra.mrb[36].mxu0 %v1483_v13 }
 0x575   : > { %v1468_v30 = vmul.f32 %v2329_v47, %v3465_v57  ;;  %v1467_v34 = vmul.f32 %v2329_v47, %v3461_v25 }
 0x577   : > { %v1486_v14 = vpack.c.bf16 %v1468_v30, %v1466_v48  ;;  %v1485_v51 = vpack.c.bf16 %v1467_v34, %v1465_v49 }
 0x579   : > { %1585 = vmatprep.mubr.bf16.mxu0 %v1486_v14 }
 0x57a   : > { %v2331_v15 = vpop.eup %2330 }
 0x57b   : > { %v1470_v17 = vmul.f32 %v2331_v15, %v3471_v27  ;;  %v1469_v57 = vmul.f32 %v2331_v15, %v3469_v26 }
 0x57c   : > { %v2333_v28 = vpop.eup %2332  ;;  %1586 = vmatmul.mubr.bf16.gmra.mrb[40].mxu0 %v1485_v51  ;;  %v2342_v51 = vld [vmem:[%s3048_s7 + $0x40] sm:$0xff] }
 0x57d   : > { %v1472_v46 = vmul.f32 %v2333_v28, %v3477_v7  ;;  %v1471_v40 = vmul.f32 %v2333_v28, %v3473_v29 }
 0x57f   : > { %v1488_v56 = vpack.c.bf16 %v1472_v46, %v1470_v17  ;;  %v1487_v25 = vpack.c.bf16 %v1471_v40, %v1469_v57  ;;  %v2343_v46 = vld [vmem:[%s3048_s7 + $0x48] sm:$0xff] }
 0x581   : > { %1593 = vmatprep.mubr.bf16.mxu0 %v1488_v56 }
 0x584   : > { %1594 = vmatmul.mubr.bf16.gmra.mrb[44].mxu0 %v1487_v25 }
 0x61f   : > { %v1947_v54 = vpop.f32.mrb[16].mxu0 }
 0x620   : > { %v1948_v58 = vpop.f32.mrb[17].mxu0 }
 0x621   : > { %v1949_v27 = vadd.f32 %v1948_v58, %v1947_v54  ;;  %v1950_v38 = vpop.f32.mrb[18].mxu0 }
 0x622   : > { %v1951_v7 = vpop.f32.mrb[19].mxu0 }
 0x623   : > { %v1604_v36 = vmul.f32 %v1949_v27, %v3513_v37  ;;  %v1952_v29 = vadd.f32 %v1951_v7, %v1950_v38  ;;  %v2344_v7 = vld [vmem:[%s3048_s7 + $0x50] sm:$0xff] }
 0x625   : > { %v1620_v26 = vadd.f32 %v2334_v42, %v1604_v36  ;;  %v1605_v41 = vmul.f32 %v1952_v29, %v3513_v37  ;;  %v2345_v42 = vld [vmem:[%s3048_s7 + $0x58] sm:$0xff] }
 0x627   : > { %1636 = vst [vmem:[%s3074_s19] sm:$0xff] %v1620_v26  ;;  %v1621_v61 = vadd.f32 %v2335_v45, %v1605_v41  ;;  %v1953_v8 = vpop.f32.mrb[20].mxu0 }
 0x628   : > { %v1954_v21 = vpop.f32.mrb[21].mxu0 }
 0x629   : > { %1637 = vst [vmem:[%s3074_s19 + $0x8] sm:$0xff] %v1621_v61  ;;  %v1955_v60 = vadd.f32 %v1954_v21, %v1953_v8  ;;  %v1956_v1 = vpop.f32.mrb[22].mxu0 }
 0x62a   : > { %v1957_v23 = vpop.f32.mrb[23].mxu0 }
 0x62b   : > { %v1606_v53 = vmul.f32 %v1955_v60, %v3513_v37  ;;  %v1958_v50 = vadd.f32 %v1957_v23, %v1956_v1  ;;  %v2346_v23 = vld [vmem:[%s3048_s7 + $0x60] sm:$0xff] }
 0x62d   : > { %v1622_v2 = vadd.f32 %v2336_v55, %v1606_v53  ;;  %v1607_v22 = vmul.f32 %v1958_v50, %v3513_v37  ;;  %v2347_v55 = vld [vmem:[%s3048_s7 + $0x68] sm:$0xff] }
 0x62f   : > { %1638 = vst [vmem:[%s3074_s19 + $0x10] sm:$0xff] %v1622_v2  ;;  %v1623_v12 = vadd.f32 %v2337_v59, %v1607_v22  ;;  %v1959_v43 = vpop.f32.mrb[24].mxu0 }
 0x630   : > { %v1960_v11 = vpop.f32.mrb[25].mxu0 }
 0x631   : > { %1639 = vst [vmem:[%s3074_s19 + $0x18] sm:$0xff] %v1623_v12  ;;  %v1961_v62 = vadd.f32 %v1960_v11, %v1959_v43  ;;  %v1962_v63 = vpop.f32.mrb[26].mxu0 }
 0x632   : > { %v1963_v0 = vpop.f32.mrb[27].mxu0 }
 0x633   : > { %v1608_v10 = vmul.f32 %v1961_v62, %v3513_v37  ;;  %v1964_v39 = vadd.f32 %v1963_v0, %v1962_v63  ;;  %v2348_v0 = vld [vmem:[%s3048_s7 + $0x70] sm:$0xff] }
 0x635   : > { %v1624_v4 = vadd.f32 %v2338_v52, %v1608_v10  ;;  %v1609_v20 = vmul.f32 %v1964_v39, %v3513_v37  ;;  %v2349_v52 = vld [vmem:[%s3048_s7 + $0x78] sm:$0xff] }
 0x637   : > { %1640 = vst [vmem:[%s3074_s19 + $0x20] sm:$0xff] %v1624_v4  ;;  %v1625_v19 = vadd.f32 %v2339_v6, %v1609_v20  ;;  %v1965_v9 = vpop.f32.mrb[28].mxu0 }
 0x638   : > { %v1966_v31 = vpop.f32.mrb[29].mxu0 }
 0x639   : > { %1641 = vst [vmem:[%s3074_s19 + $0x28] sm:$0xff] %v1625_v19  ;;  %v1967_v32 = vadd.f32 %v1966_v31, %v1965_v9  ;;  %v1968_v35 = vpop.f32.mrb[30].mxu0 }
 0x63a   : > { %v1969_v44 = vpop.f32.mrb[31].mxu0 }
 0x63b   : > { %v1610_v33 = vmul.f32 %v1967_v32, %v3513_v37  ;;  %v1970_v16 = vadd.f32 %v1969_v44, %v1968_v35 }
 0x63d   : > { %v1626_v18 = vadd.f32 %v2340_v5, %v1610_v33  ;;  %v1611_v24 = vmul.f32 %v1970_v16, %v3513_v37 }
 0x63f   : > { %1642 = vst [vmem:[%s3074_s19 + $0x30] sm:$0xff] %v1626_v18  ;;  %v1627_v13 = vadd.f32 %v2341_v3, %v1611_v24  ;;  %v1971_v47 = vpop.f32.mrb[32].mxu0 }
 0x640   : > { %v1972_v48 = vpop.f32.mrb[33].mxu0 }
 0x641   : > { %1643 = vst [vmem:[%s3074_s19 + $0x38] sm:$0xff] %v1627_v13  ;;  %v1973_v30 = vadd.f32 %v1972_v48, %v1971_v47  ;;  %v1974_v34 = vpop.f32.mrb[34].mxu0 }
 0x642   : > { %v1975_v14 = vpop.f32.mrb[35].mxu0 }
 0x643   : > { %v1612_v49 = vmul.f32 %v1973_v30, %v3513_v37  ;;  %v1976_v15 = vadd.f32 %v1975_v14, %v1974_v34 }
 0x645   : > { %v1628_v28 = vadd.f32 %v2342_v51, %v1612_v49  ;;  %v1613_v17 = vmul.f32 %v1976_v15, %v3513_v37 }
 0x647   : > { %1644 = vst [vmem:[%s3074_s19 + $0x40] sm:$0xff] %v1628_v28  ;;  %v1629_v40 = vadd.f32 %v2343_v46, %v1613_v17  ;;  %v1977_v56 = vpop.f32.mrb[36].mxu0 }
 0x648   : > { %v1978_v57 = vpop.f32.mrb[37].mxu0 }
 0x649   : > { %1645 = vst [vmem:[%s3074_s19 + $0x48] sm:$0xff] %v1629_v40  ;;  %v1979_v25 = vadd.f32 %v1978_v57, %v1977_v56  ;;  %v1980_v54 = vpop.f32.mrb[38].mxu0 }
 0x64a   : > { %v1981_v58 = vpop.f32.mrb[39].mxu0 }
 0x64b   : > { %v1614_v27 = vmul.f32 %v1979_v25, %v3513_v37  ;;  %v1982_v38 = vadd.f32 %v1981_v58, %v1980_v54 }
 0x64d   : > { %v1630_v36 = vadd.f32 %v2344_v7, %v1614_v27  ;;  %v1615_v29 = vmul.f32 %v1982_v38, %v3513_v37 }
 0x64f   : > { %1646 = vst [vmem:[%s3074_s19 + $0x50] sm:$0xff] %v1630_v36  ;;  %v1631_v26 = vadd.f32 %v2345_v42, %v1615_v29  ;;  %v1983_v41 = vpop.f32.mrb[40].mxu0 }
 0x650   : > { %v1984_v45 = vpop.f32.mrb[41].mxu0 }
 0x651   : > { %1647 = vst [vmem:[%s3074_s19 + $0x58] sm:$0xff] %v1631_v26  ;;  %v1985_v61 = vadd.f32 %v1984_v45, %v1983_v41  ;;  %v1986_v8 = vpop.f32.mrb[42].mxu0 }
 0x652   : > { %v1987_v21 = vpop.f32.mrb[43].mxu0 }
 0x653   : > { %v1616_v60 = vmul.f32 %v1985_v61, %v3513_v37  ;;  %v1988_v1 = vadd.f32 %v1987_v21, %v1986_v8 }
 0x655   : > { %v1632_v53 = vadd.f32 %v2346_v23, %v1616_v60  ;;  %v1617_v50 = vmul.f32 %v1988_v1, %v3513_v37 }
 0x657   : > { %1648 = vst [vmem:[%s3074_s19 + $0x60] sm:$0xff] %v1632_v53  ;;  %v1633_v2 = vadd.f32 %v2347_v55, %v1617_v50  ;;  %v1989_v22 = vpop.f32.mrb[44].mxu0 }
 0x658   : > { %v1990_v59 = vpop.f32.mrb[45].mxu0 }
 0x659   : > { %1649 = vst [vmem:[%s3074_s19 + $0x68] sm:$0xff] %v1633_v2  ;;  %v1991_v12 = vadd.f32 %v1990_v59, %v1989_v22  ;;  %v1992_v43 = vpop.f32.mrb[46].mxu0 }
 0x65a   : > { %v1993_v11 = vpop.f32.mrb[47].mxu0 }
 0x65b   : > { %v1618_v62 = vmul.f32 %v1991_v12, %v3513_v37  ;;  %v1994_v63 = vadd.f32 %v1993_v11, %v1992_v43 }
 0x65d   : > { %v1634_v10 = vadd.f32 %v2348_v0, %v1618_v62  ;;  %v1619_v39 = vmul.f32 %v1994_v63, %v3513_v37 }
 0x65f   : > { %1650 = vst [vmem:[%s3074_s19 + $0x70] sm:$0xff] %v1634_v10  ;;  %v1635_v4 = vadd.f32 %v2349_v52, %v1619_v39 }
 0x661   : > { %1651 = vst [vmem:[%s3074_s19 + $0x78] sm:$0xff] %v1635_v4 }
 0x662   : > { %2535 = shalt.err (!%p2532_p5)
}
 0x663   : > { %s2536_s7 = scalar_lea.hbm %s3566_s24, 2048  ;;  %s2540_s22 = scalar_lea.hbm %s3700_s25, 8192 }
 0x664   : > { %p2537_p1 = scmp.ne.s32.totalorder %s3566_s24, %s2536_s7  ;;  %p2541_p3 = scmp.lt.u32.totalorder %s3566_s24, %s3700_s25 }
 0x665   : > { %p2542_p7 = scmp.lt.u32.totalorder %s2540_s22, %s2536_s7  ;;  %p2544_p6 = scmp.lt.u32.totalorder %s2536_s7, %s3566_s24 }
 0x666   : > { %p2538_p0 = pnand %p2537_p1, %p3701_p8 }
 0x667   : > { %p2543_p9 = por %p2542_p7, %p2541_p3 }
 0x668   : > { %p2539_p11 = pneg %p2538_p0 }
 0x669   : > { %p2545_p12 = por %p2544_p6, %p2543_p9 }
 0x66b   : > { %p2546_p13 = pnand %p2545_p12, %p2539_p11 }
 0x66d   : > { %2549 = shalt.err (!%p2546_p13)
}
 0x66e   : > { %s2674_s15 = smov 128   ;;  %s2675_s4 = smov 8  }
 0x66f   : > { %2071 = dma.vmem_to_hbm [thread:$0]  (%p3701_p8), %s3568_s0, 2048, %s3566_s24, %s1653_s17, %s2674_s15, %s2674_s15, %s2675_s4  }
 0x670 PF: > { %p2106_p4 = scmp.ge.s32.totalorder %s2660_s12, 2  ;;  %s1683_s6 = sand.u32 1, %s2632_s29  }
 0x671   : > { %p3702_p10 = scmp.ne.s32.totalorder %s3679_s21, 0  ;;  %s1684_s13 = scalar_lea.sflag [#allocation7], %s1683_s6 }
 0x673   : > { %p2094_p2 = pnand %p2106_p4, %p3702_p10 }
 0x675   : > { %2615 = dma.done.wait (!%p2094_p2), %s1684_s13, 2048  }
 0x676   : > { %2617 = vsyncadd (!%p2094_p2), %s1684_s13, 4294965248  ;;  %s29_s12 = sadd.s32 1, %s2660_s12   ;;  %s3703_s5 = smov %s2990_s26 }
 0x677   : > { %p26_p5 = scmp.ge.s32.totalorder %s29_s12, 6   ;;  %s3704_s16 = sld [smem:[#allocation26_spill]] }
 0x678   : > { %s3705_s26 = smov %s2624_s27  ;;  %s3706_s27 = smov %s2628_s28 }
 0x679   : > { %s3707_s28 = smov %s3703_s5  ;;  %s3708_s29 = smov %s2636_s30 }
 0x67a   : > { %s3709_s30 = smov %s2640_s8  ;;  %s3710_s8 = smov %s2934_s14 }
 0x67b   : > { %s3711_s6 = smov %s2652_s10  ;;  %s3712_s9 = smov %s2656_s11 }
 0x67c   : > { %s3713_s10 = smov %s3716_s18  ;;  %28 = sbr.rel (!%p26_p5) target bundleno = 21 (0x15), region = 126 }
 0x67d   : > { %s3714_s11 = smov %s3704_s16 }
 0x683   :  { %1689 = vsyncpa [#allocation6], 1 }
 0x684   :  { %1691 = vsyncpa [#allocation6 + $0x1], 1 }
 0x685   :  { %1692 = vsyncpa [#allocation9], 1 }
 0x686   :  { %1694 = vsyncpa [#allocation9 + $0x1], 1 }
 0x687   :  { %1695 = vsyncpa [#allocation12], 1 }
 0x688   :  { %1696 = vsyncpa [#allocation15], 1 }
 0x689   :  { %1697 = vsyncpa [#allocation7], 1 }
 0x68a   :  { %1699 = vsyncpa [#allocation7 + $0x1], 1 }

</bundles_post_ra>
